<compile_context>
chip_gen: v5e
topology: v5e:2x2
jax: 0.10.0
libtpu: 0.0.40
codegen_flags: <defaults>
</compile_context>

<pallas_src>
import math

import jax
import jax.numpy as jnp
from jax.experimental import pallas as pl
from jax.experimental.pallas import tpu as pltpu

# ---- module hyper-parameters (synthetic, deterministic) --------------------
SAMPLE_RATE = 16000
HOP_SIZE = 64                 # analysis hop in samples
WIN = 2 * HOP_SIZE            # analysis window in samples (lane dim, = 128)
LAG_MIN = 20                  # min autocorrelation lag (-> max f0)
LAG_MAX = 79                  # max autocorrelation lag (-> min f0)
NLAG = LAG_MAX - LAG_MIN + 1  # 60 candidate lags (padded to WIN lanes)
CORR_N = WIN - LAG_MAX        # correlation support (49 samples)
EPS = 1e-12
LOG_SR = math.log(SAMPLE_RATE)


def _round_up(x: int, m: int) -> int:
    return (x + m - 1) // m * m


def _make_pitch_kernel(TB: int, n_chunks: int):
    """Build a kernel that processes one batch row per grid step in T-chunks of TB frames."""

    def pitch_kernel(nvalid_ref, band_ref, f_ref, out_ref):
        # nvalid_ref : SMEM (B,) int32          -- valid frames per row (scalar prefetch)
        # band_ref   : VMEM (WIN, WIN) f32      -- constant lag band matrix (resident)
        # f_ref      : VMEM (1, T_pad, WIN) f32 -- 128-sample analysis frames for this row
        # out_ref    : VMEM (1, T_pad, 1)       -- normalized log-F0 (zero past valid frames)
        b = pl.program_id(0)
        n_valid = nvalid_ref[b]

        def chunk_mask(t0):
            t_idx = t0 + jax.lax.broadcasted_iota(jnp.int32, (TB, 1), 0)
            return (t_idx < n_valid).astype(jnp.float32)

        # ---- pass 1: per-frame pitch -> raw logf0 staged in out_ref, masked sum
        total = jnp.zeros((1, 1), jnp.float32)
        for ci in range(n_chunks):
            t0 = ci * TB
            frames = f_ref[0, t0:t0 + TB, :].astype(jnp.float32)        # (TB, WIN)

            # lag energies on the MXU: el[t, l] = sum_{c in [lag, lag+CORR_N)} x[t,c]^2
            sq = frames * frames
            el = jnp.dot(sq, band_ref[...], preferred_element_type=jnp.float32)

            # numerators, lags-in-lanes: r[t, l] = sum_{c<CORR_N} x[t,c] * x[t,c+lag]
            # one XLU roll + one broadcast-MAC per support step, no cross-lane reductions.
            r = jnp.zeros((TB, WIN), jnp.float32)
            for c in range(CORR_N):
                # lane l of `shifted` holds x[t, l + c + LAG_MIN] (no wrap for l < NLAG)
                shifted = pltpu.roll(frames, WIN - (c + LAG_MIN), axis=1)
                r = r + frames[:, c:c + 1] * shifted

            # dense scoring + single lane arg-max (e0 factor dropped: it is a
            # per-frame positive constant and cannot change the arg-max lag).
            lane = jax.lax.broadcasted_iota(jnp.int32, (TB, WIN), 1)
            score = r * jax.lax.rsqrt(el + 1e-9)
            score = jnp.where(lane < NLAG, score, -jnp.inf)
            best = jnp.max(score, axis=-1, keepdims=True)                # (TB, 1)
            best_lag = jnp.min(
                jnp.where(score >= best, lane.astype(jnp.float32), jnp.float32(WIN)),
                axis=-1, keepdims=True) + jnp.float32(LAG_MIN)           # ties -> smallest lag

            logf0 = jnp.float32(LOG_SR) - jnp.log(best_lag)              # exact log(SR / lag)
            out_ref[0, t0:t0 + TB, :] = logf0.astype(out_ref.dtype)
            total = total + jnp.sum(logf0 * chunk_mask(t0), keepdims=True)

        denom = jnp.maximum(n_valid.astype(jnp.float32), 1.0)
        mean = total / denom                                             # (1, 1)

        # ---- pass 2: masked sum of squared deviations (numerically stable std)
        ssq = jnp.zeros((1, 1), jnp.float32)
        for ci in range(n_chunks):
            t0 = ci * TB
            v = out_ref[0, t0:t0 + TB, :].astype(jnp.float32)
            d = (v - mean) * chunk_mask(t0)
            ssq = ssq + jnp.sum(d * d, keepdims=True)

        inv_std = 1.0 / (jnp.sqrt(ssq / denom) + jnp.float32(EPS))       # (1, 1)

        # ---- pass 3: normalize and zero frames past the valid length ----------
        for ci in range(n_chunks):
            t0 = ci * TB
            v = out_ref[0, t0:t0 + TB, :].astype(jnp.float32)
            out_ref[0, t0:t0 + TB, :] = ((v - mean) * inv_std *
                                         chunk_mask(t0)).astype(out_ref.dtype)

    return pitch_kernel


def pitch_forward(audio: jax.Array, length: jax.Array) -> jax.Array:
    """audio: (B, S) float32, length: (B,) int32 -> (B, T) float32, T = S // HOP_SIZE."""
    B, S = audio.shape
    T = S // HOP_SIZE

    # Frame-chunk size inside the kernel (bounds live vregs); pad T up to it.
    TB = min(64, _round_up(T, 8))
    T_pad = _round_up(T, TB)
    n_chunks = T_pad // TB

    # Assemble lane-dense 128-sample analysis windows in the wrapper:
    # frame t = audio[t*HOP : t*HOP + 2*HOP] (zero-padded tail; padded frames masked).
    total_samples = (T_pad + 1) * HOP_SIZE
    audio_pad = jnp.pad(audio, ((0, 0), (0, total_samples - S)))
    rows = audio_pad.reshape(B, T_pad + 1, HOP_SIZE)
    frames = jnp.concatenate([rows[:, :T_pad, :], rows[:, 1:, :]], axis=-1)   # (B, T_pad, WIN)

    # Constant banded 0/1 matrix (column l sums x^2 over [lag_l, lag_l + CORR_N)).
    c_idx = jnp.arange(WIN, dtype=jnp.int32)[:, None]
    l_idx = jnp.arange(WIN, dtype=jnp.int32)[None, :]
    lag = l_idx + LAG_MIN
    band = ((c_idx >= lag) & (c_idx < lag + CORR_N) & (l_idx < NLAG)).astype(jnp.float32)

    # pyworld's frame count ~= floor(len / hop) + 1, clipped to T.
    n_valid = jnp.minimum(length // HOP_SIZE + 1, T).astype(jnp.int32)

    kernel = _make_pitch_kernel(TB, n_chunks)
    out = pl.pallas_call(
        kernel,
        out_shape=jax.ShapeDtypeStruct((B, T_pad, 1), audio.dtype),
        grid_spec=pltpu.PrefetchScalarGridSpec(
            num_scalar_prefetch=1,
            grid=(B,),
            in_specs=[
                # Same block every step -> DMA'd once, resident across the grid.
                pl.BlockSpec((WIN, WIN), lambda b, nv: (0, 0)),
                pl.BlockSpec((1, T_pad, WIN), lambda b, nv: (b, 0, 0)),
            ],
            out_specs=pl.BlockSpec((1, T_pad, 1), lambda b, nv: (b, 0, 0)),
        ),
        compiler_params=pltpu.CompilerParams(
            dimension_semantics=("parallel",)),
    )(n_valid, band, frames)

    return out[:, :T, 0]                                                 # (B, T)


if __name__ == "__main__":
    key = jax.random.PRNGKey(0)
    B, S = 2, 1024
    noise = 0.1 * jax.random.normal(key, (B, S), dtype=jnp.float32)
    t = jnp.arange(S, dtype=jnp.float32)
    tone = jnp.sin(2.0 * jnp.pi * 330.0 * t / SAMPLE_RATE)[None, :]      # periodic component
    audio = (tone + noise).astype(jnp.float32)
    length = jnp.array([1024, 700], dtype=jnp.int32)

    out = pitch_forward(audio, length)
    jax.block_until_ready(out)
    assert out.shape == (B, S // HOP_SIZE)
    assert bool(jnp.all(jnp.isfinite(out)))
    print("KERNEL_OK")
</pallas_src>

<mosaic_0001>
module attributes {stable_mosaic.version = 11 : i64} {
  func.func @pitch_kernel(%arg0: i32, %arg1: memref<2xi32, #tpu.memory_space<smem>>, %arg2: memref<128x128xf32, #tpu.memory_space<vmem>>, %arg3: memref<1x16x128xf32, #tpu.memory_space<vmem>>, %arg4: memref<1x16x1xf32, #tpu.memory_space<vmem>>) attributes {dimension_semantics = [#tpu.dimension_semantics<parallel>], iteration_bounds = array<i64: 2>, scalar_prefetch = 1 : i64, scratch_operands = 0 : i64, tpu.core_type = #tpu.core_type<tc>, window_params = [{pipeline_mode = #tpu.pipeline_mode<synchronous>, transform_indices = @transform_0, window_bounds = array<i64: 128, 128>}, {transform_indices = @transform_1, window_bounds = array<i64: 1, 16, 128>}, {transform_indices = @transform_2, window_bounds = array<i64: 1, 16, 1>}]} {
    %0 = arith.index_cast %arg0 : i32 to index
    %1 = memref.load %arg1[%0] : memref<2xi32, #tpu.memory_space<smem>>
    %cst = arith.constant 0.000000e+00 : f32
    %2 = vector.broadcast %cst : f32 to vector<1x1xf32>
    %c0 = arith.constant 0 : index
    %c0_0 = arith.constant 0 : index
    %c0_1 = arith.constant 0 : index
    %3 = vector.load %arg3[%c0, %c0_0, %c0_1] : memref<1x16x128xf32, #tpu.memory_space<vmem>>, vector<1x16x128xf32>
    %4 = vector.shape_cast %3 : vector<1x16x128xf32> to vector<16x128xf32>
    %5 = arith.mulf %4, %4 : vector<16x128xf32>
    %c0_2 = arith.constant 0 : index
    %c0_3 = arith.constant 0 : index
    %6 = vector.load %arg2[%c0_2, %c0_3] : memref<128x128xf32, #tpu.memory_space<vmem>>, vector<128x128xf32>
    %cst_4 = arith.constant dense<0.000000e+00> : vector<16x128xf32>
    %7 = tpu.matmul %5, %6, %cst_4 {dimension_numbers = #tpu.dot_dimension_numbers<[1], [0], [0], [1], [0, 0, 1, 1], [], []>} : vector<16x128xf32>, vector<128x128xf32>, vector<16x128xf32> -> vector<16x128xf32>
    %cst_5 = arith.constant 0.000000e+00 : f32
    %8 = vector.broadcast %cst_5 : f32 to vector<16x128xf32>
    %c108_i32 = arith.constant 108 : i32
    %9 = tpu.dynamic_rotate %4 by %c108_i32 dim 1 : vector<16x128xf32>, i32 -> vector<16x128xf32>
    %10 = vector.extract_strided_slice %4 {offsets = [0, 0], sizes = [16, 1], strides = [1, 1]} : vector<16x128xf32> to vector<16x1xf32>
    %11 = vector.broadcast %10 : vector<16x1xf32> to vector<16x128xf32>
    %12 = arith.mulf %11, %9 : vector<16x128xf32>
    %13 = arith.addf %8, %12 : vector<16x128xf32>
    %c107_i32 = arith.constant 107 : i32
    %14 = tpu.dynamic_rotate %4 by %c107_i32 dim 1 : vector<16x128xf32>, i32 -> vector<16x128xf32>
    %15 = vector.extract_strided_slice %4 {offsets = [0, 1], sizes = [16, 1], strides = [1, 1]} : vector<16x128xf32> to vector<16x1xf32>
    %16 = vector.broadcast %15 : vector<16x1xf32> to vector<16x128xf32>
    %17 = arith.mulf %16, %14 : vector<16x128xf32>
    %18 = arith.addf %13, %17 : vector<16x128xf32>
    %c106_i32 = arith.constant 106 : i32
    %19 = tpu.dynamic_rotate %4 by %c106_i32 dim 1 : vector<16x128xf32>, i32 -> vector<16x128xf32>
    %20 = vector.extract_strided_slice %4 {offsets = [0, 2], sizes = [16, 1], strides = [1, 1]} : vector<16x128xf32> to vector<16x1xf32>
    %21 = vector.broadcast %20 : vector<16x1xf32> to vector<16x128xf32>
    %22 = arith.mulf %21, %19 : vector<16x128xf32>
    %23 = arith.addf %18, %22 : vector<16x128xf32>
    %c105_i32 = arith.constant 105 : i32
    %24 = tpu.dynamic_rotate %4 by %c105_i32 dim 1 : vector<16x128xf32>, i32 -> vector<16x128xf32>
    %25 = vector.extract_strided_slice %4 {offsets = [0, 3], sizes = [16, 1], strides = [1, 1]} : vector<16x128xf32> to vector<16x1xf32>
    %26 = vector.broadcast %25 : vector<16x1xf32> to vector<16x128xf32>
    %27 = arith.mulf %26, %24 : vector<16x128xf32>
    %28 = arith.addf %23, %27 : vector<16x128xf32>
    %c104_i32 = arith.constant 104 : i32
    %29 = tpu.dynamic_rotate %4 by %c104_i32 dim 1 : vector<16x128xf32>, i32 -> vector<16x128xf32>
    %30 = vector.extract_strided_slice %4 {offsets = [0, 4], sizes = [16, 1], strides = [1, 1]} : vector<16x128xf32> to vector<16x1xf32>
    %31 = vector.broadcast %30 : vector<16x1xf32> to vector<16x128xf32>
    %32 = arith.mulf %31, %29 : vector<16x128xf32>
    %33 = arith.addf %28, %32 : vector<16x128xf32>
    %c103_i32 = arith.constant 103 : i32
    %34 = tpu.dynamic_rotate %4 by %c103_i32 dim 1 : vector<16x128xf32>, i32 -> vector<16x128xf32>
    %35 = vector.extract_strided_slice %4 {offsets = [0, 5], sizes = [16, 1], strides = [1, 1]} : vector<16x128xf32> to vector<16x1xf32>
    %36 = vector.broadcast %35 : vector<16x1xf32> to vector<16x128xf32>
    %37 = arith.mulf %36, %34 : vector<16x128xf32>
    %38 = arith.addf %33, %37 : vector<16x128xf32>
    %c102_i32 = arith.constant 102 : i32
    %39 = tpu.dynamic_rotate %4 by %c102_i32 dim 1 : vector<16x128xf32>, i32 -> vector<16x128xf32>
    %40 = vector.extract_strided_slice %4 {offsets = [0, 6], sizes = [16, 1], strides = [1, 1]} : vector<16x128xf32> to vector<16x1xf32>
    %41 = vector.broadcast %40 : vector<16x1xf32> to vector<16x128xf32>
    %42 = arith.mulf %41, %39 : vector<16x128xf32>
    %43 = arith.addf %38, %42 : vector<16x128xf32>
    %c101_i32 = arith.constant 101 : i32
    %44 = tpu.dynamic_rotate %4 by %c101_i32 dim 1 : vector<16x128xf32>, i32 -> vector<16x128xf32>
    %45 = vector.extract_strided_slice %4 {offsets = [0, 7], sizes = [16, 1], strides = [1, 1]} : vector<16x128xf32> to vector<16x1xf32>
    %46 = vector.broadcast %45 : vector<16x1xf32> to vector<16x128xf32>
    %47 = arith.mulf %46, %44 : vector<16x128xf32>
    %48 = arith.addf %43, %47 : vector<16x128xf32>
    %c100_i32 = arith.constant 100 : i32
    %49 = tpu.dynamic_rotate %4 by %c100_i32 dim 1 : vector<16x128xf32>, i32 -> vector<16x128xf32>
    %50 = vector.extract_strided_slice %4 {offsets = [0, 8], sizes = [16, 1], strides = [1, 1]} : vector<16x128xf32> to vector<16x1xf32>
    %51 = vector.broadcast %50 : vector<16x1xf32> to vector<16x128xf32>
    %52 = arith.mulf %51, %49 : vector<16x128xf32>
    %53 = arith.addf %48, %52 : vector<16x128xf32>
    %c99_i32 = arith.constant 99 : i32
    %54 = tpu.dynamic_rotate %4 by %c99_i32 dim 1 : vector<16x128xf32>, i32 -> vector<16x128xf32>
    %55 = vector.extract_strided_slice %4 {offsets = [0, 9], sizes = [16, 1], strides = [1, 1]} : vector<16x128xf32> to vector<16x1xf32>
    %56 = vector.broadcast %55 : vector<16x1xf32> to vector<16x128xf32>
    %57 = arith.mulf %56, %54 : vector<16x128xf32>
    %58 = arith.addf %53, %57 : vector<16x128xf32>
    %c98_i32 = arith.constant 98 : i32
    %59 = tpu.dynamic_rotate %4 by %c98_i32 dim 1 : vector<16x128xf32>, i32 -> vector<16x128xf32>
    %60 = vector.extract_strided_slice %4 {offsets = [0, 10], sizes = [16, 1], strides = [1, 1]} : vector<16x128xf32> to vector<16x1xf32>
    %61 = vector.broadcast %60 : vector<16x1xf32> to vector<16x128xf32>
    %62 = arith.mulf %61, %59 : vector<16x128xf32>
    %63 = arith.addf %58, %62 : vector<16x128xf32>
    %c97_i32 = arith.constant 97 : i32
    %64 = tpu.dynamic_rotate %4 by %c97_i32 dim 1 : vector<16x128xf32>, i32 -> vector<16x128xf32>
    %65 = vector.extract_strided_slice %4 {offsets = [0, 11], sizes = [16, 1], strides = [1, 1]} : vector<16x128xf32> to vector<16x1xf32>
    %66 = vector.broadcast %65 : vector<16x1xf32> to vector<16x128xf32>
    %67 = arith.mulf %66, %64 : vector<16x128xf32>
    %68 = arith.addf %63, %67 : vector<16x128xf32>
    %c96_i32 = arith.constant 96 : i32
    %69 = tpu.dynamic_rotate %4 by %c96_i32 dim 1 : vector<16x128xf32>, i32 -> vector<16x128xf32>
    %70 = vector.extract_strided_slice %4 {offsets = [0, 12], sizes = [16, 1], strides = [1, 1]} : vector<16x128xf32> to vector<16x1xf32>
    %71 = vector.broadcast %70 : vector<16x1xf32> to vector<16x128xf32>
    %72 = arith.mulf %71, %69 : vector<16x128xf32>
    %73 = arith.addf %68, %72 : vector<16x128xf32>
    %c95_i32 = arith.constant 95 : i32
    %74 = tpu.dynamic_rotate %4 by %c95_i32 dim 1 : vector<16x128xf32>, i32 -> vector<16x128xf32>
    %75 = vector.extract_strided_slice %4 {offsets = [0, 13], sizes = [16, 1], strides = [1, 1]} : vector<16x128xf32> to vector<16x1xf32>
    %76 = vector.broadcast %75 : vector<16x1xf32> to vector<16x128xf32>
    %77 = arith.mulf %76, %74 : vector<16x128xf32>
    %78 = arith.addf %73, %77 : vector<16x128xf32>
    %c94_i32 = arith.constant 94 : i32
    %79 = tpu.dynamic_rotate %4 by %c94_i32 dim 1 : vector<16x128xf32>, i32 -> vector<16x128xf32>
    %80 = vector.extract_strided_slice %4 {offsets = [0, 14], sizes = [16, 1], strides = [1, 1]} : vector<16x128xf32> to vector<16x1xf32>
    %81 = vector.broadcast %80 : vector<16x1xf32> to vector<16x128xf32>
    %82 = arith.mulf %81, %79 : vector<16x128xf32>
    %83 = arith.addf %78, %82 : vector<16x128xf32>
    %c93_i32 = arith.constant 93 : i32
    %84 = tpu.dynamic_rotate %4 by %c93_i32 dim 1 : vector<16x128xf32>, i32 -> vector<16x128xf32>
    %85 = vector.extract_strided_slice %4 {offsets = [0, 15], sizes = [16, 1], strides = [1, 1]} : vector<16x128xf32> to vector<16x1xf32>
    %86 = vector.broadcast %85 : vector<16x1xf32> to vector<16x128xf32>
    %87 = arith.mulf %86, %84 : vector<16x128xf32>
    %88 = arith.addf %83, %87 : vector<16x128xf32>
    %c92_i32 = arith.constant 92 : i32
    %89 = tpu.dynamic_rotate %4 by %c92_i32 dim 1 : vector<16x128xf32>, i32 -> vector<16x128xf32>
    %90 = vector.extract_strided_slice %4 {offsets = [0, 16], sizes = [16, 1], strides = [1, 1]} : vector<16x128xf32> to vector<16x1xf32>
    %91 = vector.broadcast %90 : vector<16x1xf32> to vector<16x128xf32>
    %92 = arith.mulf %91, %89 : vector<16x128xf32>
    %93 = arith.addf %88, %92 : vector<16x128xf32>
    %c91_i32 = arith.constant 91 : i32
    %94 = tpu.dynamic_rotate %4 by %c91_i32 dim 1 : vector<16x128xf32>, i32 -> vector<16x128xf32>
    %95 = vector.extract_strided_slice %4 {offsets = [0, 17], sizes = [16, 1], strides = [1, 1]} : vector<16x128xf32> to vector<16x1xf32>
    %96 = vector.broadcast %95 : vector<16x1xf32> to vector<16x128xf32>
    %97 = arith.mulf %96, %94 : vector<16x128xf32>
    %98 = arith.addf %93, %97 : vector<16x128xf32>
    %c90_i32 = arith.constant 90 : i32
    %99 = tpu.dynamic_rotate %4 by %c90_i32 dim 1 : vector<16x128xf32>, i32 -> vector<16x128xf32>
    %100 = vector.extract_strided_slice %4 {offsets = [0, 18], sizes = [16, 1], strides = [1, 1]} : vector<16x128xf32> to vector<16x1xf32>
    %101 = vector.broadcast %100 : vector<16x1xf32> to vector<16x128xf32>
    %102 = arith.mulf %101, %99 : vector<16x128xf32>
    %103 = arith.addf %98, %102 : vector<16x128xf32>
    %c89_i32 = arith.constant 89 : i32
    %104 = tpu.dynamic_rotate %4 by %c89_i32 dim 1 : vector<16x128xf32>, i32 -> vector<16x128xf32>
    %105 = vector.extract_strided_slice %4 {offsets = [0, 19], sizes = [16, 1], strides = [1, 1]} : vector<16x128xf32> to vector<16x1xf32>
    %106 = vector.broadcast %105 : vector<16x1xf32> to vector<16x128xf32>
    %107 = arith.mulf %106, %104 : vector<16x128xf32>
    %108 = arith.addf %103, %107 : vector<16x128xf32>
    %c88_i32 = arith.constant 88 : i32
    %109 = tpu.dynamic_rotate %4 by %c88_i32 dim 1 : vector<16x128xf32>, i32 -> vector<16x128xf32>
    %110 = vector.extract_strided_slice %4 {offsets = [0, 20], sizes = [16, 1], strides = [1, 1]} : vector<16x128xf32> to vector<16x1xf32>
    %111 = vector.broadcast %110 : vector<16x1xf32> to vector<16x128xf32>
    %112 = arith.mulf %111, %109 : vector<16x128xf32>
    %113 = arith.addf %108, %112 : vector<16x128xf32>
    %c87_i32 = arith.constant 87 : i32
    %114 = tpu.dynamic_rotate %4 by %c87_i32 dim 1 : vector<16x128xf32>, i32 -> vector<16x128xf32>
    %115 = vector.extract_strided_slice %4 {offsets = [0, 21], sizes = [16, 1], strides = [1, 1]} : vector<16x128xf32> to vector<16x1xf32>
    %116 = vector.broadcast %115 : vector<16x1xf32> to vector<16x128xf32>
    %117 = arith.mulf %116, %114 : vector<16x128xf32>
    %118 = arith.addf %113, %117 : vector<16x128xf32>
    %c86_i32 = arith.constant 86 : i32
    %119 = tpu.dynamic_rotate %4 by %c86_i32 dim 1 : vector<16x128xf32>, i32 -> vector<16x128xf32>
    %120 = vector.extract_strided_slice %4 {offsets = [0, 22], sizes = [16, 1], strides = [1, 1]} : vector<16x128xf32> to vector<16x1xf32>
    %121 = vector.broadcast %120 : vector<16x1xf32> to vector<16x128xf32>
    %122 = arith.mulf %121, %119 : vector<16x128xf32>
    %123 = arith.addf %118, %122 : vector<16x128xf32>
    %c85_i32 = arith.constant 85 : i32
    %124 = tpu.dynamic_rotate %4 by %c85_i32 dim 1 : vector<16x128xf32>, i32 -> vector<16x128xf32>
    %125 = vector.extract_strided_slice %4 {offsets = [0, 23], sizes = [16, 1], strides = [1, 1]} : vector<16x128xf32> to vector<16x1xf32>
    %126 = vector.broadcast %125 : vector<16x1xf32> to vector<16x128xf32>
    %127 = arith.mulf %126, %124 : vector<16x128xf32>
    %128 = arith.addf %123, %127 : vector<16x128xf32>
    %c84_i32 = arith.constant 84 : i32
    %129 = tpu.dynamic_rotate %4 by %c84_i32 dim 1 : vector<16x128xf32>, i32 -> vector<16x128xf32>
    %130 = vector.extract_strided_slice %4 {offsets = [0, 24], sizes = [16, 1], strides = [1, 1]} : vector<16x128xf32> to vector<16x1xf32>
    %131 = vector.broadcast %130 : vector<16x1xf32> to vector<16x128xf32>
    %132 = arith.mulf %131, %129 : vector<16x128xf32>
    %133 = arith.addf %128, %132 : vector<16x128xf32>
    %c83_i32 = arith.constant 83 : i32
    %134 = tpu.dynamic_rotate %4 by %c83_i32 dim 1 : vector<16x128xf32>, i32 -> vector<16x128xf32>
    %135 = vector.extract_strided_slice %4 {offsets = [0, 25], sizes = [16, 1], strides = [1, 1]} : vector<16x128xf32> to vector<16x1xf32>
    %136 = vector.broadcast %135 : vector<16x1xf32> to vector<16x128xf32>
    %137 = arith.mulf %136, %134 : vector<16x128xf32>
    %138 = arith.addf %133, %137 : vector<16x128xf32>
    %c82_i32 = arith.constant 82 : i32
    %139 = tpu.dynamic_rotate %4 by %c82_i32 dim 1 : vector<16x128xf32>, i32 -> vector<16x128xf32>
    %140 = vector.extract_strided_slice %4 {offsets = [0, 26], sizes = [16, 1], strides = [1, 1]} : vector<16x128xf32> to vector<16x1xf32>
    %141 = vector.broadcast %140 : vector<16x1xf32> to vector<16x128xf32>
    %142 = arith.mulf %141, %139 : vector<16x128xf32>
    %143 = arith.addf %138, %142 : vector<16x128xf32>
    %c81_i32 = arith.constant 81 : i32
    %144 = tpu.dynamic_rotate %4 by %c81_i32 dim 1 : vector<16x128xf32>, i32 -> vector<16x128xf32>
    %145 = vector.extract_strided_slice %4 {offsets = [0, 27], sizes = [16, 1], strides = [1, 1]} : vector<16x128xf32> to vector<16x1xf32>
    %146 = vector.broadcast %145 : vector<16x1xf32> to vector<16x128xf32>
    %147 = arith.mulf %146, %144 : vector<16x128xf32>
    %148 = arith.addf %143, %147 : vector<16x128xf32>
    %c80_i32 = arith.constant 80 : i32
    %149 = tpu.dynamic_rotate %4 by %c80_i32 dim 1 : vector<16x128xf32>, i32 -> vector<16x128xf32>
    %150 = vector.extract_strided_slice %4 {offsets = [0, 28], sizes = [16, 1], strides = [1, 1]} : vector<16x128xf32> to vector<16x1xf32>
    %151 = vector.broadcast %150 : vector<16x1xf32> to vector<16x128xf32>
    %152 = arith.mulf %151, %149 : vector<16x128xf32>
    %153 = arith.addf %148, %152 : vector<16x128xf32>
    %c79_i32 = arith.constant 79 : i32
    %154 = tpu.dynamic_rotate %4 by %c79_i32 dim 1 : vector<16x128xf32>, i32 -> vector<16x128xf32>
    %155 = vector.extract_strided_slice %4 {offsets = [0, 29], sizes = [16, 1], strides = [1, 1]} : vector<16x128xf32> to vector<16x1xf32>
    %156 = vector.broadcast %155 : vector<16x1xf32> to vector<16x128xf32>
    %157 = arith.mulf %156, %154 : vector<16x128xf32>
    %158 = arith.addf %153, %157 : vector<16x128xf32>
    %c78_i32 = arith.constant 78 : i32
    %159 = tpu.dynamic_rotate %4 by %c78_i32 dim 1 : vector<16x128xf32>, i32 -> vector<16x128xf32>
    %160 = vector.extract_strided_slice %4 {offsets = [0, 30], sizes = [16, 1], strides = [1, 1]} : vector<16x128xf32> to vector<16x1xf32>
    %161 = vector.broadcast %160 : vector<16x1xf32> to vector<16x128xf32>
    %162 = arith.mulf %161, %159 : vector<16x128xf32>
    %163 = arith.addf %158, %162 : vector<16x128xf32>
    %c77_i32 = arith.constant 77 : i32
    %164 = tpu.dynamic_rotate %4 by %c77_i32 dim 1 : vector<16x128xf32>, i32 -> vector<16x128xf32>
    %165 = vector.extract_strided_slice %4 {offsets = [0, 31], sizes = [16, 1], strides = [1, 1]} : vector<16x128xf32> to vector<16x1xf32>
    %166 = vector.broadcast %165 : vector<16x1xf32> to vector<16x128xf32>
    %167 = arith.mulf %166, %164 : vector<16x128xf32>
    %168 = arith.addf %163, %167 : vector<16x128xf32>
    %c76_i32 = arith.constant 76 : i32
    %169 = tpu.dynamic_rotate %4 by %c76_i32 dim 1 : vector<16x128xf32>, i32 -> vector<16x128xf32>
    %170 = vector.extract_strided_slice %4 {offsets = [0, 32], sizes = [16, 1], strides = [1, 1]} : vector<16x128xf32> to vector<16x1xf32>
    %171 = vector.broadcast %170 : vector<16x1xf32> to vector<16x128xf32>
    %172 = arith.mulf %171, %169 : vector<16x128xf32>
    %173 = arith.addf %168, %172 : vector<16x128xf32>
    %c75_i32 = arith.constant 75 : i32
    %174 = tpu.dynamic_rotate %4 by %c75_i32 dim 1 : vector<16x128xf32>, i32 -> vector<16x128xf32>
    %175 = vector.extract_strided_slice %4 {offsets = [0, 33], sizes = [16, 1], strides = [1, 1]} : vector<16x128xf32> to vector<16x1xf32>
    %176 = vector.broadcast %175 : vector<16x1xf32> to vector<16x128xf32>
    %177 = arith.mulf %176, %174 : vector<16x128xf32>
    %178 = arith.addf %173, %177 : vector<16x128xf32>
    %c74_i32 = arith.constant 74 : i32
    %179 = tpu.dynamic_rotate %4 by %c74_i32 dim 1 : vector<16x128xf32>, i32 -> vector<16x128xf32>
    %180 = vector.extract_strided_slice %4 {offsets = [0, 34], sizes = [16, 1], strides = [1, 1]} : vector<16x128xf32> to vector<16x1xf32>
    %181 = vector.broadcast %180 : vector<16x1xf32> to vector<16x128xf32>
    %182 = arith.mulf %181, %179 : vector<16x128xf32>
    %183 = arith.addf %178, %182 : vector<16x128xf32>
    %c73_i32 = arith.constant 73 : i32
    %184 = tpu.dynamic_rotate %4 by %c73_i32 dim 1 : vector<16x128xf32>, i32 -> vector<16x128xf32>
    %185 = vector.extract_strided_slice %4 {offsets = [0, 35], sizes = [16, 1], strides = [1, 1]} : vector<16x128xf32> to vector<16x1xf32>
    %186 = vector.broadcast %185 : vector<16x1xf32> to vector<16x128xf32>
    %187 = arith.mulf %186, %184 : vector<16x128xf32>
    %188 = arith.addf %183, %187 : vector<16x128xf32>
    %c72_i32 = arith.constant 72 : i32
    %189 = tpu.dynamic_rotate %4 by %c72_i32 dim 1 : vector<16x128xf32>, i32 -> vector<16x128xf32>
    %190 = vector.extract_strided_slice %4 {offsets = [0, 36], sizes = [16, 1], strides = [1, 1]} : vector<16x128xf32> to vector<16x1xf32>
    %191 = vector.broadcast %190 : vector<16x1xf32> to vector<16x128xf32>
    %192 = arith.mulf %191, %189 : vector<16x128xf32>
    %193 = arith.addf %188, %192 : vector<16x128xf32>
    %c71_i32 = arith.constant 71 : i32
    %194 = tpu.dynamic_rotate %4 by %c71_i32 dim 1 : vector<16x128xf32>, i32 -> vector<16x128xf32>
    %195 = vector.extract_strided_slice %4 {offsets = [0, 37], sizes = [16, 1], strides = [1, 1]} : vector<16x128xf32> to vector<16x1xf32>
    %196 = vector.broadcast %195 : vector<16x1xf32> to vector<16x128xf32>
    %197 = arith.mulf %196, %194 : vector<16x128xf32>
    %198 = arith.addf %193, %197 : vector<16x128xf32>
    %c70_i32 = arith.constant 70 : i32
    %199 = tpu.dynamic_rotate %4 by %c70_i32 dim 1 : vector<16x128xf32>, i32 -> vector<16x128xf32>
    %200 = vector.extract_strided_slice %4 {offsets = [0, 38], sizes = [16, 1], strides = [1, 1]} : vector<16x128xf32> to vector<16x1xf32>
    %201 = vector.broadcast %200 : vector<16x1xf32> to vector<16x128xf32>
    %202 = arith.mulf %201, %199 : vector<16x128xf32>
    %203 = arith.addf %198, %202 : vector<16x128xf32>
    %c69_i32 = arith.constant 69 : i32
    %204 = tpu.dynamic_rotate %4 by %c69_i32 dim 1 : vector<16x128xf32>, i32 -> vector<16x128xf32>
    %205 = vector.extract_strided_slice %4 {offsets = [0, 39], sizes = [16, 1], strides = [1, 1]} : vector<16x128xf32> to vector<16x1xf32>
    %206 = vector.broadcast %205 : vector<16x1xf32> to vector<16x128xf32>
    %207 = arith.mulf %206, %204 : vector<16x128xf32>
    %208 = arith.addf %203, %207 : vector<16x128xf32>
    %c68_i32 = arith.constant 68 : i32
    %209 = tpu.dynamic_rotate %4 by %c68_i32 dim 1 : vector<16x128xf32>, i32 -> vector<16x128xf32>
    %210 = vector.extract_strided_slice %4 {offsets = [0, 40], sizes = [16, 1], strides = [1, 1]} : vector<16x128xf32> to vector<16x1xf32>
    %211 = vector.broadcast %210 : vector<16x1xf32> to vector<16x128xf32>
    %212 = arith.mulf %211, %209 : vector<16x128xf32>
    %213 = arith.addf %208, %212 : vector<16x128xf32>
    %c67_i32 = arith.constant 67 : i32
    %214 = tpu.dynamic_rotate %4 by %c67_i32 dim 1 : vector<16x128xf32>, i32 -> vector<16x128xf32>
    %215 = vector.extract_strided_slice %4 {offsets = [0, 41], sizes = [16, 1], strides = [1, 1]} : vector<16x128xf32> to vector<16x1xf32>
    %216 = vector.broadcast %215 : vector<16x1xf32> to vector<16x128xf32>
    %217 = arith.mulf %216, %214 : vector<16x128xf32>
    %218 = arith.addf %213, %217 : vector<16x128xf32>
    %c66_i32 = arith.constant 66 : i32
    %219 = tpu.dynamic_rotate %4 by %c66_i32 dim 1 : vector<16x128xf32>, i32 -> vector<16x128xf32>
    %220 = vector.extract_strided_slice %4 {offsets = [0, 42], sizes = [16, 1], strides = [1, 1]} : vector<16x128xf32> to vector<16x1xf32>
    %221 = vector.broadcast %220 : vector<16x1xf32> to vector<16x128xf32>
    %222 = arith.mulf %221, %219 : vector<16x128xf32>
    %223 = arith.addf %218, %222 : vector<16x128xf32>
    %c65_i32 = arith.constant 65 : i32
    %224 = tpu.dynamic_rotate %4 by %c65_i32 dim 1 : vector<16x128xf32>, i32 -> vector<16x128xf32>
    %225 = vector.extract_strided_slice %4 {offsets = [0, 43], sizes = [16, 1], strides = [1, 1]} : vector<16x128xf32> to vector<16x1xf32>
    %226 = vector.broadcast %225 : vector<16x1xf32> to vector<16x128xf32>
    %227 = arith.mulf %226, %224 : vector<16x128xf32>
    %228 = arith.addf %223, %227 : vector<16x128xf32>
    %c64_i32 = arith.constant 64 : i32
    %229 = tpu.dynamic_rotate %4 by %c64_i32 dim 1 : vector<16x128xf32>, i32 -> vector<16x128xf32>
    %230 = vector.extract_strided_slice %4 {offsets = [0, 44], sizes = [16, 1], strides = [1, 1]} : vector<16x128xf32> to vector<16x1xf32>
    %231 = vector.broadcast %230 : vector<16x1xf32> to vector<16x128xf32>
    %232 = arith.mulf %231, %229 : vector<16x128xf32>
    %233 = arith.addf %228, %232 : vector<16x128xf32>
    %c63_i32 = arith.constant 63 : i32
    %234 = tpu.dynamic_rotate %4 by %c63_i32 dim 1 : vector<16x128xf32>, i32 -> vector<16x128xf32>
    %235 = vector.extract_strided_slice %4 {offsets = [0, 45], sizes = [16, 1], strides = [1, 1]} : vector<16x128xf32> to vector<16x1xf32>
    %236 = vector.broadcast %235 : vector<16x1xf32> to vector<16x128xf32>
    %237 = arith.mulf %236, %234 : vector<16x128xf32>
    %238 = arith.addf %233, %237 : vector<16x128xf32>
    %c62_i32 = arith.constant 62 : i32
    %239 = tpu.dynamic_rotate %4 by %c62_i32 dim 1 : vector<16x128xf32>, i32 -> vector<16x128xf32>
    %240 = vector.extract_strided_slice %4 {offsets = [0, 46], sizes = [16, 1], strides = [1, 1]} : vector<16x128xf32> to vector<16x1xf32>
    %241 = vector.broadcast %240 : vector<16x1xf32> to vector<16x128xf32>
    %242 = arith.mulf %241, %239 : vector<16x128xf32>
    %243 = arith.addf %238, %242 : vector<16x128xf32>
    %c61_i32 = arith.constant 61 : i32
    %244 = tpu.dynamic_rotate %4 by %c61_i32 dim 1 : vector<16x128xf32>, i32 -> vector<16x128xf32>
    %245 = vector.extract_strided_slice %4 {offsets = [0, 47], sizes = [16, 1], strides = [1, 1]} : vector<16x128xf32> to vector<16x1xf32>
    %246 = vector.broadcast %245 : vector<16x1xf32> to vector<16x128xf32>
    %247 = arith.mulf %246, %244 : vector<16x128xf32>
    %248 = arith.addf %243, %247 : vector<16x128xf32>
    %c60_i32 = arith.constant 60 : i32
    %249 = tpu.dynamic_rotate %4 by %c60_i32 dim 1 : vector<16x128xf32>, i32 -> vector<16x128xf32>
    %250 = vector.extract_strided_slice %4 {offsets = [0, 48], sizes = [16, 1], strides = [1, 1]} : vector<16x128xf32> to vector<16x1xf32>
    %251 = vector.broadcast %250 : vector<16x1xf32> to vector<16x128xf32>
    %252 = arith.mulf %251, %249 : vector<16x128xf32>
    %253 = arith.addf %248, %252 : vector<16x128xf32>
    %254 = tpu.iota {dimensions = array<i32: 1>} : vector<16x128xi32>
    %cst_6 = arith.constant 9.99999971E-10 : f32
    %255 = vector.broadcast %cst_6 : f32 to vector<16x128xf32>
    %256 = arith.addf %7, %255 : vector<16x128xf32>
    %257 = math.rsqrt %256 : vector<16x128xf32>
    %258 = arith.mulf %253, %257 : vector<16x128xf32>
    %c60_i32_7 = arith.constant 60 : i32
    %259 = vector.broadcast %c60_i32_7 : i32 to vector<16x128xi32>
    %260 = arith.cmpi slt, %254, %259 : vector<16x128xi32>
    %cst_8 = arith.constant 0xFF800000 : f32
    %261 = vector.broadcast %cst_8 : f32 to vector<16x128xf32>
    %262 = arith.select %260, %258, %261 : vector<16x128xi1>, vector<16x128xf32>
    %cst_9 = arith.constant dense<0xFF800000> : vector<16xf32>
    %263 = vector.multi_reduction <maximumf>, %262, %cst_9 [1] : vector<16x128xf32> to vector<16xf32>
    %264 = vector.shape_cast %263 : vector<16xf32> to vector<16x1xf32>
    %265 = vector.broadcast %264 : vector<16x1xf32> to vector<16x128xf32>
    %266 = arith.cmpf oge, %262, %265 : vector<16x128xf32>
    %267 = arith.sitofp %254 : vector<16x128xi32> to vector<16x128xf32>
    %cst_10 = arith.constant 1.280000e+02 : f32
    %268 = vector.broadcast %cst_10 : f32 to vector<16x128xf32>
    %269 = arith.select %266, %267, %268 : vector<16x128xi1>, vector<16x128xf32>
    %cst_11 = arith.constant dense<0x7F800000> : vector<16xf32>
    %270 = vector.multi_reduction <minimumf>, %269, %cst_11 [1] : vector<16x128xf32> to vector<16xf32>
    %271 = vector.shape_cast %270 : vector<16xf32> to vector<16x1xf32>
    %cst_12 = arith.constant 2.000000e+01 : f32
    %272 = vector.broadcast %cst_12 : f32 to vector<16x1xf32>
    %273 = arith.addf %271, %272 : vector<16x1xf32>
    %274 = math.log %273 : vector<16x1xf32>
    %cst_13 = arith.constant 9.68034362 : f32
    %275 = vector.broadcast %cst_13 : f32 to vector<16x1xf32>
    %276 = arith.subf %275, %274 : vector<16x1xf32>
    %c0_14 = arith.constant 0 : index
    %c0_15 = arith.constant 0 : index
    %c0_16 = arith.constant 0 : index
    %277 = vector.load %arg4[%c0_14, %c0_15, %c0_16] : memref<1x16x1xf32, #tpu.memory_space<vmem>>, vector<1x16x1xf32>
    %278 = vector.shape_cast %277 : vector<1x16x1xf32> to vector<16x1xf32>
    %279 = vector.shape_cast %276 : vector<16x1xf32> to vector<1x16x1xf32>
    tpu.vector_store %arg4[%c0_14, %c0_15, %c0_16], %279 {strides = array<i32>} : memref<1x16x1xf32, #tpu.memory_space<vmem>>, vector<1x16x1xf32>,
    %280 = tpu.iota {dimensions = array<i32: 0>} : vector<16x1xi32>
    %c0_i32 = arith.constant 0 : i32
    %281 = vector.broadcast %c0_i32 : i32 to vector<16x1xi32>
    %282 = arith.addi %281, %280 : vector<16x1xi32>
    %283 = vector.broadcast %1 : i32 to vector<16x1xi32>
    %284 = arith.cmpi slt, %282, %283 : vector<16x1xi32>
    %285 = arith.extui %284 : vector<16x1xi1> to vector<16x1xi32>
    %286 = arith.sitofp %285 : vector<16x1xi32> to vector<16x1xf32>
    %287 = arith.mulf %276, %286 : vector<16x1xf32>
    %288 = vector.shape_cast %287 : vector<16x1xf32> to vector<1x16x1xf32>
    %cst_17 = arith.constant dense<0.000000e+00> : vector<1xf32>
    %289 = vector.multi_reduction <add>, %288, %cst_17 [1, 2] : vector<1x16x1xf32> to vector<1xf32>
    %290 = vector.shape_cast %289 : vector<1xf32> to vector<1x1x1xf32>
    %291 = vector.extract %290[0, 0, 0] : f32 from vector<1x1x1xf32>
    %292 = vector.broadcast %291 : f32 to vector<1x1xf32>
    %293 = arith.addf %2, %292 : vector<1x1xf32>
    %294 = arith.sitofp %1 : i32 to f32
    %cst_18 = arith.constant 1.000000e+00 : f32
    %295 = arith.maximumf %294, %cst_18 : f32
    %296 = vector.broadcast %295 : f32 to vector<1x1xf32>
    %297 = arith.divf %293, %296 : vector<1x1xf32>
    %cst_19 = arith.constant 0.000000e+00 : f32
    %298 = vector.broadcast %cst_19 : f32 to vector<1x1xf32>
    %c0_20 = arith.constant 0 : index
    %c0_21 = arith.constant 0 : index
    %c0_22 = arith.constant 0 : index
    %299 = vector.load %arg4[%c0_20, %c0_21, %c0_22] : memref<1x16x1xf32, #tpu.memory_space<vmem>>, vector<1x16x1xf32>
    %300 = vector.shape_cast %299 : vector<1x16x1xf32> to vector<16x1xf32>
    %301 = vector.broadcast %297 : vector<1x1xf32> to vector<16x1xf32>
    %302 = arith.subf %300, %301 : vector<16x1xf32>
    %303 = tpu.iota {dimensions = array<i32: 0>} : vector<16x1xi32>
    %c0_i32_23 = arith.constant 0 : i32
    %304 = vector.broadcast %c0_i32_23 : i32 to vector<16x1xi32>
    %305 = arith.addi %304, %303 : vector<16x1xi32>
    %306 = vector.broadcast %1 : i32 to vector<16x1xi32>
    %307 = arith.cmpi slt, %305, %306 : vector<16x1xi32>
    %308 = arith.extui %307 : vector<16x1xi1> to vector<16x1xi32>
    %309 = arith.sitofp %308 : vector<16x1xi32> to vector<16x1xf32>
    %310 = arith.mulf %302, %309 : vector<16x1xf32>
    %311 = arith.mulf %310, %310 : vector<16x1xf32>
    %312 = vector.shape_cast %311 : vector<16x1xf32> to vector<1x16x1xf32>
    %cst_24 = arith.constant dense<0.000000e+00> : vector<1xf32>
    %313 = vector.multi_reduction <add>, %312, %cst_24 [1, 2] : vector<1x16x1xf32> to vector<1xf32>
    %314 = vector.shape_cast %313 : vector<1xf32> to vector<1x1x1xf32>
    %315 = vector.extract %314[0, 0, 0] : f32 from vector<1x1x1xf32>
    %316 = vector.broadcast %315 : f32 to vector<1x1xf32>
    %317 = arith.addf %298, %316 : vector<1x1xf32>
    %318 = vector.broadcast %295 : f32 to vector<1x1xf32>
    %319 = arith.divf %317, %318 : vector<1x1xf32>
    %320 = math.sqrt %319 : vector<1x1xf32>
    %cst_25 = arith.constant 9.99999996E-13 : f32
    %321 = vector.broadcast %cst_25 : f32 to vector<1x1xf32>
    %322 = arith.addf %320, %321 : vector<1x1xf32>
    %cst_26 = arith.constant 1.000000e+00 : f32
    %323 = vector.broadcast %cst_26 : f32 to vector<1x1xf32>
    %324 = arith.divf %323, %322 : vector<1x1xf32>
    %c0_27 = arith.constant 0 : index
    %c0_28 = arith.constant 0 : index
    %c0_29 = arith.constant 0 : index
    %325 = vector.load %arg4[%c0_27, %c0_28, %c0_29] : memref<1x16x1xf32, #tpu.memory_space<vmem>>, vector<1x16x1xf32>
    %326 = vector.shape_cast %325 : vector<1x16x1xf32> to vector<16x1xf32>
    %327 = vector.broadcast %297 : vector<1x1xf32> to vector<16x1xf32>
    %328 = arith.subf %326, %327 : vector<16x1xf32>
    %329 = vector.broadcast %324 : vector<1x1xf32> to vector<16x1xf32>
    %330 = arith.mulf %328, %329 : vector<16x1xf32>
    %331 = tpu.iota {dimensions = array<i32: 0>} : vector<16x1xi32>
    %c0_i32_30 = arith.constant 0 : i32
    %332 = vector.broadcast %c0_i32_30 : i32 to vector<16x1xi32>
    %333 = arith.addi %332, %331 : vector<16x1xi32>
    %334 = vector.broadcast %1 : i32 to vector<16x1xi32>
    %335 = arith.cmpi slt, %333, %334 : vector<16x1xi32>
    %336 = arith.extui %335 : vector<16x1xi1> to vector<16x1xi32>
    %337 = arith.sitofp %336 : vector<16x1xi32> to vector<16x1xf32>
    %338 = arith.mulf %330, %337 : vector<16x1xf32>
    %c0_31 = arith.constant 0 : index
    %c0_32 = arith.constant 0 : index
    %c0_33 = arith.constant 0 : index
    %339 = vector.load %arg4[%c0_31, %c0_32, %c0_33] : memref<1x16x1xf32, #tpu.memory_space<vmem>>, vector<1x16x1xf32>
    %340 = vector.shape_cast %339 : vector<1x16x1xf32> to vector<16x1xf32>
    %341 = vector.shape_cast %338 : vector<16x1xf32> to vector<1x16x1xf32>
    tpu.vector_store %arg4[%c0_31, %c0_32, %c0_33], %341 {strides = array<i32>} : memref<1x16x1xf32, #tpu.memory_space<vmem>>, vector<1x16x1xf32>,
    return
  }
  func.func @transform_0(%arg0: i32, %arg1: memref<2xi32, #tpu.memory_space<smem>>) -> (i32, i32) {
    %c0_i32 = arith.constant 0 : i32
    %c0_i32_0 = arith.constant 0 : i32
    %c0_i32_1 = arith.constant 0 : i32
    return %c0_i32, %c0_i32_0 : i32, i32
  }
  func.func @transform_1(%arg0: i32, %arg1: memref<2xi32, #tpu.memory_space<smem>>) -> (i32, i32, i32) {
    %c0_i32 = arith.constant 0 : i32
    %c0_i32_0 = arith.constant 0 : i32
    %c0_i32_1 = arith.constant 0 : i32
    return %arg0, %c0_i32, %c0_i32_0 : i32, i32, i32
  }
  func.func @transform_2(%arg0: i32, %arg1: memref<2xi32, #tpu.memory_space<smem>>) -> (i32, i32, i32) {
    %c0_i32 = arith.constant 0 : i32
    %c0_i32_0 = arith.constant 0 : i32
    %c0_i32_1 = arith.constant 0 : i32
    return %arg0, %c0_i32, %c0_i32_0 : i32, i32, i32
  }
}

</mosaic_0001>

<bundles_post_ra>
// kernel: tpu_custom_call.1
= control target key start
LH: loop header
LB: loop body
LE: loop exit
PB: predicated region body
PF: predicated region fallthrough
CT: control target
= control target key end

     0   :  { %s1671_s15 = smov [#allocation3]   ;;  %s2206_s0 = inlined_call_operand.hbm [shape: s32[2], index: 0, kind: input, shape index: {}]   ;;  %s2207_s1 = inlined_call_operand.hbm [shape: f32[128,128], index: 1, kind: input, shape index: {}]   ;;  %s2208_s2 = inlined_call_operand.hbm [shape: f32[2,16,128], index: 2, kind: input, shape index: {}]   ;;  %s2209_s3 = inlined_call_operand.vmem [shape: f32[2,16,1], index: 3, kind: output, shape index: {}]  }
   0x1   :  { %s9_s14 = sshll.u32 %s2206_s0, 4  ;;  %s10_s14 = int_to_ptr.hbm [resolvable:$true] %s9_s14 }
   0x2   :  { %12 = dma.hbm_to_smem %s10_s14, 16, %s1671_s15, [#allocation2] }
   0x3   :  { %1645 = dma.done.wait [#allocation2], 16 }
   0x4   :  { %1646 = vsyncadd [#allocation2], 4294967280 }
   0x5   :  { %15 = sfence }
   0x6   :  { %16 = vsyncpa [#allocation5], 0 }
   0x7   :  { %17 = vsyncpa [#allocation7], 0 }
   0x8   :  { %19 = vsyncpa [#allocation7 + $0x1], 0  ;;  %s1798_s16 = smov 0   ;;  %s1800_s17 = smov 0  }
   0x9   :  { %s1802_s18 = smov 0   ;;  %s1804_s19 = smov 0  }
   0xa LB: > { %s1817_s0 = sadd.s32 4294967295, %s1669_s19   ;;  %p66_p0 = scmp.ne.s32.totalorder %s1661_s17, %s1657_s16  ;;  %s1669_s19 = sphi %s1804_s19, %s2216_s19   ;;  %s1665_s18 = sphi %s1802_s18, %s2215_s18   ;;  %s1661_s17 = sphi %s1800_s17, %s2214_s17   ;;  %s1657_s16 = sphi %s1798_s16, %s2213_s16  }
   0xb   : > { %p67_p1 = scmp.eq.s32.totalorder %s1817_s0, 0  ;;  %p1254_p2 = scmp.ge.s32.totalorder %s1669_s19, 1 }
   0xc   : > { %p103_p3 = scmp.lt.s32.totalorder %s1669_s19, 3  ;;  %s114_s23 = sshll.u32 %s2207_s1, 4  ;;  %s115_s23 = int_to_ptr.hbm [resolvable:$true] %s114_s23 }
   0xd   : > { %p1825_p4 = por %p67_p1, %p66_p0  ;;  %s1672_s25 = smov [#allocation4]  }
   0xe   : > { %p1832_p5 = pnand %p1254_p2, %p103_p3  ;;  %s116_s26 = sshll.u32 %s1672_s25, 4  ;;  %s117_s26 = int_to_ptr.vmem [resolvable:$true] %s116_s26 }
   0xf   : > { %s1841_s27 = sadd.s32 1, %s1669_s19   ;;  %s1673_s28 = smov 128  }
  0x10   : > { %p1297_p6 = pneg %p1832_p5  ;;  %s1674_s29 = smov 8  }
  0x11   : > { %s50_s30 = ssub.s32 %s1669_s19, %s1841_s27  ;;  %s53_s4 = sadd.s32 1, %s1665_s18 }
  0x12   : > { %p1298_p7 = pnand %p1297_p6, %p67_p1  ;;  %p51_p8 = scmp.eq.s32.totalorder %s50_s30, 0 }
  0x13   : > { %p60_p9 = scmp.ne.s32.totalorder %s1665_s18, %s1661_s17  ;;  %p61_p10 = scmp.eq.s32.totalorder %s1669_s19, 0 }
  0x14   : > { %1300 = dma.hbm_to_vmem [thread:$0]  (!%p1298_p7), %s115_s23, 2048, %s117_s26, [#allocation5], %s1673_s28, %s1673_s28, %s1674_s29  }
  0x15   : > { %p1306_p11 = scmp.lt.s32.totalorder %s1669_s19, 2  ;;  %p62_p12 = por %p61_p10, %p60_p9 }
  0x16   : > { %s1854_s5 = scalar_select %p51_p8, %s1665_s18, %s53_s4  }
  0x17   : > { %s130_s6 = sand.u32 1, %s1665_s18   ;;  %s1269_s8 = sshll.u32 %s1669_s19, 4 }
  0x18   : > { %s1257_s7 = sshll.u32 %s130_s6, 4  ;;  %s139_s11 = scalar_lea.hbm %s2208_s2, %s1269_s8 }
  0x19   : > { %s134_s12 = scalar_lea.vmem [#allocation6], %s1257_s7  ;;  %s140_s14 = sshll.u32 %s139_s11, 4  ;;  %s141_s14 = int_to_ptr.hbm [resolvable:$true] %s140_s14 }
  0x1a   : > { %s142_s13 = sshll.u32 %s134_s12, 4  ;;  %p1861_p13 = pnand %p1306_p11, %p62_p12  ;;  %s143_s13 = int_to_ptr.vmem [resolvable:$true] %s142_s13 }
  0x1b   : > { %s131_s16 = scalar_lea.sflag [#allocation7], %s130_s6  ;;  %s1599_s21 = sshra.s32 %s141_s14, 4  ;;  %s1600_s21 = int_to_ptr.hbm [resolvable:$true] %s1599_s21 }
  0x1c   : > { %s1601_s22 = scalar_lea.hbm %s1600_s21, 16  ;;  %p1603_p2 = pneg %p1861_p13 }
  0x1d   : > { %p1602_p0 = scmp.ne.s32.totalorder %s1600_s21, %s1601_s22  ;;  %s1606_s25 = scalar_lea.hbm %s2208_s2, 32 }
  0x1e   : > { %p1607_p7 = scmp.lt.s32.totalorder %s1600_s21, %s2208_s2  ;;  %p1608_p8 = scmp.lt.s32.totalorder %s1606_s25, %s1601_s22 }
  0x1f   : > { %p1604_p3 = pnand %p1603_p2, %p1602_p0 }
  0x20   : > { %p1609_p9 = por %p1608_p8, %p1607_p7 }
  0x21   : > { %p1605_p6 = pneg %p1604_p3 }
  0x23   : > { %p1610_p10 = pnand %p1609_p9, %p1605_p6 }
  0x25   : > { %1613 = shalt.err (!%p1610_p10)
}
  0x26   : > { %1304 = dma.hbm_to_vmem [thread:$0]  (!%p1861_p13), %s141_s14, 256, %s143_s13, %s131_s16, %s1673_s28, %s1673_s28, %s1674_s29  }
  0x27   : > { %154 = sbr.rel (%p1832_p5) target bundleno = 1420 (0x58c), region = 28 }
  0x2c   : > { %1648 = dma.done.wait (%p67_p1), [#allocation5], 2048  }
  0x2d   : > { %1650 = vsyncadd (%p67_p1), [#allocation5], 4294965248  ;;  %s161_s4 = sand.u32 1, %s1661_s17  }
  0x2e   : > { %s1262_s6 = sshll.u32 %s161_s4, 4  ;;  %s162_s7 = scalar_lea.sflag [#allocation7], %s161_s4 }
  0x2f   : > { %s1885_s8 = scalar_lea.vmem [#allocation6], %s1262_s6 }
  0x30   : > { %1652 = dma.done.wait (%p1825_p4), %s162_s7, 256  }
  0x31   : > { %1654 = vsyncadd (%p1825_p4), %s162_s7, 4294967040  ;;  %v1675_v0 = vmov 0   ;;  %v1676_v1 = vmov 1   ;;  %v1677_v2 = vmov 2   ;;  %v1892_v3 = vld [vmem:[%s1885_s8] sm:$0xff]  ;;  %s1678_s24 = smov 107  }
  0x32   : > { %1444 = vset.pattern.permute.xlu1 %v1675_v0  ;;  %1445 = vset.pattern.permute.xlu0 %v1676_v1  ;;  %s1679_s28 = smov 108   ;;  %v1898_v4 = vld [vmem:[%s1885_s8 + $0x8] sm:$0xff]  ;;  %s1680_s20 = smov 106   ;;  %v1681_v5 = vmov 3   ;;  %v1684_v6 = vmov 4   ;;  %v1686_v7 = vmov 5  }
  0x33   : > { %1447 = vset.pattern.permute.xlu2 %v1677_v2  ;;  %219 = vperm.xlu1 %1444, %v1892_v3   ;;  %s1682_s29 = smov 105   ;;  %s1683_s9 = smov 104   ;;  %v1687_v8 = vmov 6   ;;  %v1690_v9 = vmov 8   ;;  %v1691_v10 = vmov 7   ;;  %v1694_v11 = vmov 10  }
  0x34   : > { %231 = vrot.lane.b32.xlu2 %v1892_v3, %s1678_s24  ;;  %213 = vrot.lane.b32.xlu0 %v1892_v3, %s1679_s28  ;;  %s1685_s10 = smov 102   ;;  %s1688_s11 = smov 103   ;;  %v1695_v14 = vmov 9   ;;  %v1698_v16 = vmov 12   ;;  %v1700_v22 = vmov 11   ;;  %v1702_v27 = vmov 14  }
  0x35   : > { %s1689_s12 = smov 100   ;;  %s1692_s13 = smov 101   ;;  %v1703_v31 = vmov 13   ;;  %v1706_v51 = vmov 16   ;;  %v1707_v59 = vmov 15   ;;  %vm1070_vm11 = vcmask 7168  }
  0x36   : > { %s1693_s14 = smov 98   ;;  %s1696_s15 = smov 96  }
  0x37   : > { %s1697_s16 = smov 99   ;;  %s1699_s21 = smov 94  }
  0x38   : > { %s1701_s22 = smov 97   ;;  %s1704_s19 = smov 92  }
  0x39   : > { %s1705_s23 = smov 95   ;;  %s1708_s25 = smov 90  }
  0x3a   : > { %s1709_s26 = smov 93   ;;  %s1712_s30 = smov 88  }
  0x3b   : > { %224 = vperm.xlu1 %1444, %v1898_v4   ;;  %s1713_s4 = smov 91   ;;  %s1716_s6 = smov 86  }
  0x3c   : > { %233 = vrot.lane.b32.xlu2 %v1898_v4, %s1678_s24  ;;  %215 = vrot.lane.b32.xlu0 %v1898_v4, %s1679_s28  ;;  %s1717_s7 = smov 89   ;;  %s1720_s24 = smov 84  }
  0x3d   : > { %s1721_s28 = smov 87   ;;  %p187_p1 = scmp.lt.s32.totalorder %s1817_s0, 1 }
  0x43   : > { %1446 = vset.pattern.permute.xlu1 %v1676_v1 }
  0x44   : > { %247 = vrot.lane.b32.xlu2 %v1892_v3, %s1680_s20  ;;  %236 = vperm.xlu0 %1445, %v1892_v3  }
  0x45   : > { %240 = vperm.xlu1 %1446, %v1898_v4  }
  0x4c   : > { %252 = vperm.xlu2 %1447, %v1892_v3   ;;  %1448 = vset.pattern.permute.xlu0 %v1677_v2 }
  0x4d   : > { %249 = vrot.lane.b32.xlu1 %v1898_v4, %s1680_s20  ;;  %256 = vperm.xlu0 %1448, %v1898_v4   ;;  %s1724_s20 = smov 82  }
  0x4e   : > { %1449 = vset.pattern.permute.xlu1 %v1681_v5 }
  0x54   : > { %265 = vrot.lane.b32.xlu2 %v1898_v4, %s1682_s29 }
  0x55   : > { %263 = vrot.lane.b32.xlu1 %v1892_v3, %s1682_s29  ;;  %1450 = vset.pattern.permute.xlu2 %v1681_v5  ;;  %s1725_s29 = smov 85  }
  0x56   : > { %279 = vrot.lane.b32.xlu0 %v1892_v3, %s1683_s9 }
  0x57   : > { %1452 = vset.pattern.permute.xlu0 %v1684_v6 }
  0x5c   : > { %272 = vperm.xlu2 %1450, %v1898_v4  }
  0x5d   : > { %268 = vperm.xlu1 %1449, %v1892_v3  }
  0x5e   : > { %288 = vperm.xlu0 %1452, %v1898_v4  }
  0x64   : > { %1451 = vset.pattern.permute.xlu2 %v1684_v6 }
  0x65   : > { %284 = vperm.xlu2 %1451, %v1892_v3   ;;  %281 = vrot.lane.b32.xlu1 %v1898_v4, %s1683_s9  ;;  %s1727_s9 = smov 80  }
  0x66   : > { %311 = vrot.lane.b32.xlu0 %v1892_v3, %s1685_s10  ;;  %1453 = vset.pattern.permute.xlu1 %v1686_v7 }
  0x67   : > { %1456 = vset.pattern.permute.xlu0 %v1687_v8 }
  0x6d   : > { %297 = vrot.lane.b32.xlu2 %v1898_v4, %s1688_s11  ;;  %295 = vrot.lane.b32.xlu1 %v1892_v3, %s1688_s11  ;;  %s1731_s11 = smov 78  }
  0x6e   : > { %1454 = vset.pattern.permute.xlu2 %v1686_v7  ;;  %320 = vperm.xlu0 %1456, %v1898_v4   ;;  %v1710_v7 = vmov 18  }
  0x75   : > { %304 = vperm.xlu2 %1454, %v1898_v4   ;;  %300 = vperm.xlu1 %1453, %v1892_v3  }
  0x76   : > { %343 = vrot.lane.b32.xlu0 %v1892_v3, %s1689_s12 }
  0x77   : > { %1460 = vset.pattern.permute.xlu0 %v1690_v9 }
  0x7d   : > { %1455 = vset.pattern.permute.xlu2 %v1687_v8  ;;  %313 = vrot.lane.b32.xlu1 %v1898_v4, %s1685_s10  ;;  %s1729_s10 = smov 83  }
  0x7e   : > { %316 = vperm.xlu2 %1455, %v1892_v3   ;;  %1457 = vset.pattern.permute.xlu1 %v1691_v10 }
  0x7f   : > { %352 = vperm.xlu0 %1460, %v1898_v4  }
  0x85   : > { %327 = vrot.lane.b32.xlu1 %v1892_v3, %s1692_s13 }
  0x86   : > { %329 = vrot.lane.b32.xlu2 %v1898_v4, %s1692_s13  ;;  %s1735_s13 = smov 76  }
  0x87   : > { %1458 = vset.pattern.permute.xlu2 %v1691_v10  ;;  %375 = vrot.lane.b32.xlu0 %v1892_v3, %s1693_s14 }
  0x88   : > { %1464 = vset.pattern.permute.xlu0 %v1694_v11 }
  0x8d   : > { %332 = vperm.xlu1 %1457, %v1892_v3  }
  0x8e   : > { %336 = vperm.xlu2 %1458, %v1898_v4   ;;  %v232_v12 = vpop.permute.xlu2 %231 }
  0x8f   : > { %384 = vperm.xlu0 %1464, %v1898_v4  }
  0x95   : > { %345 = vrot.lane.b32.xlu1 %v1898_v4, %s1689_s12  ;;  %s1733_s12 = smov 81  }
  0x96   : > { %1459 = vset.pattern.permute.xlu2 %v1690_v9  ;;  %v234_v13 = vpop.permute.xlu2 %233  ;;  %1461 = vset.pattern.permute.xlu1 %v1695_v14 }
  0x97   : > { %348 = vperm.xlu2 %1459, %v1892_v3   ;;  %407 = vrot.lane.b32.xlu0 %v1892_v3, %s1696_s15 }
  0x98   : > { %1468 = vset.pattern.permute.xlu0 %v1698_v16 }
  0x9d   : > { %359 = vrot.lane.b32.xlu1 %v1892_v3, %s1697_s16 }
  0x9e   : > { %v248_v15 = vpop.permute.xlu2 %247 }
  0x9f   : > { %361 = vrot.lane.b32.xlu2 %v1898_v4, %s1697_s16  ;;  %416 = vperm.xlu0 %1468, %v1898_v4   ;;  %s1741_s16 = smov 77  }
  0xa0   : > { %1462 = vset.pattern.permute.xlu2 %v1695_v14 }
  0xa5   : > { %364 = vperm.xlu1 %1461, %v1892_v3   ;;  %v220_v18 = vpop.permute.xlu1 %219 }
  0xa6   : > { %v253_v17 = vpop.permute.xlu2 %252  ;;  %v214_v19 = vpop.permute.xlu0 %213 }
  0xa7   : > { %368 = vperm.xlu2 %1462, %v1898_v4   ;;  %439 = vrot.lane.b32.xlu0 %v1892_v3, %s1699_s21  ;;  %v227_v35 = vmul.f32 %v220_v18, %v214_v19  ;;  %v259_v37 = vmul.f32 %v253_v17, %v248_v15  ;;  %v1711_v15 = vmov 17  }
  0xa8   : > { %1472 = vset.pattern.permute.xlu0 %v1702_v27 }
  0xad   : > { %377 = vrot.lane.b32.xlu1 %v1898_v4, %s1693_s14  ;;  %v225_v21 = vpop.permute.xlu1 %224  ;;  %s1737_s14 = smov 79  }
  0xae   : > { %v266_v20 = vpop.permute.xlu2 %265  ;;  %1465 = vset.pattern.permute.xlu1 %v1700_v22  ;;  %v216_v23 = vpop.permute.xlu0 %215 }
  0xaf   : > { %1463 = vset.pattern.permute.xlu2 %v1694_v11  ;;  %448 = vperm.xlu0 %1472, %v1898_v4   ;;  %v228_v42 = vmul.f32 %v225_v21, %v216_v23 }
  0xb0   : > { %380 = vperm.xlu2 %1463, %v1892_v3  }
  0xb5   : > { %391 = vrot.lane.b32.xlu1 %v1892_v3, %s1701_s22 }
  0xb6   : > { %v273_v24 = vpop.permute.xlu2 %272  ;;  %v237_v26 = vpop.permute.xlu0 %236 }
  0xb7   : > { %v241_v25 = vpop.permute.xlu1 %240  ;;  %471 = vrot.lane.b32.xlu0 %v1892_v3, %s1704_s19  ;;  %v243_v34 = vmul.f32 %v237_v26, %v232_v12  ;;  %v276_v52 = vmul.f32 %v273_v24, %v266_v20 }
  0xb8   : > { %393 = vrot.lane.b32.xlu2 %v1898_v4, %s1701_s22  ;;  %v244_v38 = vmul.f32 %v241_v25, %v234_v13  ;;  %1476 = vset.pattern.permute.xlu0 %v1706_v51  ;;  %v1714_v25 = vmov 20   ;;  %s1745_s22 = smov 75  }
  0xb9   : > { %1466 = vset.pattern.permute.xlu2 %v1700_v22  ;;  %v245_v36 = vadd.f32 %v243_v34, %v227_v35 }
  0xba   : > { %v246_v46 = vadd.f32 %v244_v38, %v228_v42 }
  0xbb   : > { %v261_v43 = vadd.f32 %v259_v37, %v245_v36 }
  0xbd   : > { %396 = vperm.xlu1 %1465, %v1892_v3  }
  0xbf   : > { %v285_v28 = vpop.permute.xlu2 %284  ;;  %v250_v29 = vpop.permute.xlu1 %249  ;;  %480 = vperm.xlu0 %1476, %v1898_v4  }
  0xc0   : > { %400 = vperm.xlu2 %1466, %v1898_v4   ;;  %v257_v30 = vpop.permute.xlu0 %256 }
  0xc1   : > { %v260_v44 = vmul.f32 %v257_v30, %v250_v29 }
  0xc3   : > { %v262_v49 = vadd.f32 %v260_v44, %v246_v46  ;;  %v1718_v44 = vmov 22  }
  0xc5   : > { %409 = vrot.lane.b32.xlu1 %v1898_v4, %s1696_s15  ;;  %v278_v55 = vadd.f32 %v276_v52, %v262_v49  ;;  %s1740_s15 = smov 74  }
  0xc6   : > { %1469 = vset.pattern.permute.xlu1 %v1703_v31 }
  0xc7   : > { %v298_v32 = vpop.permute.xlu2 %297  ;;  %v264_v33 = vpop.permute.xlu1 %263  ;;  %503 = vrot.lane.b32.xlu0 %v1892_v3, %s1708_s25 }
  0xc8   : > { %1467 = vset.pattern.permute.xlu2 %v1698_v16  ;;  %v280_v39 = vpop.permute.xlu0 %279  ;;  %1480 = vset.pattern.permute.xlu0 %v1710_v7 }
  0xc9   : > { %412 = vperm.xlu2 %1467, %v1892_v3   ;;  %v291_v47 = vmul.f32 %v285_v28, %v280_v39 }
  0xcd   : > { %423 = vrot.lane.b32.xlu1 %v1892_v3, %s1705_s23 }
  0xcf   : > { %v305_v40 = vpop.permute.xlu2 %304  ;;  %v269_v41 = vpop.permute.xlu1 %268  ;;  %512 = vperm.xlu0 %1480, %v1898_v4  }
  0xd0   : > { %v275_v45 = vmul.f32 %v269_v41, %v264_v33  ;;  %v289_v53 = vpop.permute.xlu0 %288  ;;  %v308_v8 = vmul.f32 %v305_v40, %v298_v32  ;;  %v1715_v33 = vmov 19  }
  0xd1   : > { %425 = vrot.lane.b32.xlu2 %v1898_v4, %s1705_s23  ;;  %s1749_s23 = smov 73  }
  0xd2   : > { %v277_v48 = vadd.f32 %v275_v45, %v261_v43  ;;  %1470 = vset.pattern.permute.xlu2 %v1703_v31 }
  0xd4   : > { %v293_v50 = vadd.f32 %v291_v47, %v277_v48 }
  0xd5   : > { %428 = vperm.xlu1 %1469, %v1892_v3  }
  0xd7   : > { %v282_v54 = vpop.permute.xlu1 %281  ;;  %535 = vrot.lane.b32.xlu0 %v1892_v3, %s1712_s30 }
  0xd8   : > { %v292_v56 = vmul.f32 %v289_v53, %v282_v54  ;;  %v317_v57 = vpop.permute.xlu2 %316  ;;  %v312_v62 = vpop.permute.xlu0 %311  ;;  %1484 = vset.pattern.permute.xlu0 %v1714_v25 }
  0xd9   : > { %432 = vperm.xlu2 %1470, %v1898_v4   ;;  %v323_v2 = vmul.f32 %v317_v57, %v312_v62 }
  0xda   : > { %v294_v58 = vadd.f32 %v292_v56, %v278_v55 }
  0xdc   : > { %v310_v11 = vadd.f32 %v308_v8, %v294_v58 }
  0xdd   : > { %441 = vrot.lane.b32.xlu1 %v1898_v4, %s1699_s21  ;;  %s1744_s21 = smov 72  }
  0xde   : > { %1473 = vset.pattern.permute.xlu1 %v1707_v59 }
  0xdf   : > { %v296_v60 = vpop.permute.xlu1 %295  ;;  %544 = vperm.xlu0 %1484, %v1898_v4  }
  0xe0   : > { %v330_v61 = vpop.permute.xlu2 %329  ;;  %v321_v9 = vpop.permute.xlu0 %320 }
  0xe1   : > { %1471 = vset.pattern.permute.xlu2 %v1702_v27 }
  0xe2   : > { %444 = vperm.xlu2 %1471, %v1892_v3  }
  0xe5   : > { %455 = vrot.lane.b32.xlu1 %v1892_v3, %s1709_s26 }
  0xe7   : > { %v301_v63 = vpop.permute.xlu1 %300  ;;  %567 = vrot.lane.b32.xlu0 %v1892_v3, %s1716_s6 }
  0xe8   : > { %v307_v0 = vmul.f32 %v301_v63, %v296_v60  ;;  %v337_v1 = vpop.permute.xlu2 %336  ;;  %v344_v18 = vpop.permute.xlu0 %343  ;;  %1488 = vset.pattern.permute.xlu0 %v1718_v44  ;;  %v1722_v63 = vmov 24  }
  0xe9   : > { %v340_v26 = vmul.f32 %v337_v1, %v330_v61 }
  0xea   : > { %v309_v5 = vadd.f32 %v307_v0, %v293_v50  ;;  %457 = vrot.lane.b32.xlu2 %v1898_v4, %s1709_s26  ;;  %s1753_s26 = smov 71  }
  0xeb   : > { %1474 = vset.pattern.permute.xlu2 %v1707_v59 }
  0xec   : > { %v325_v6 = vadd.f32 %v323_v2, %v309_v5 }
  0xed   : > { %460 = vperm.xlu1 %1473, %v1892_v3  }
  0xef   : > { %v314_v10 = vpop.permute.xlu1 %313  ;;  %576 = vperm.xlu0 %1488, %v1898_v4  }
  0xf0   : > { %v324_v12 = vmul.f32 %v321_v9, %v314_v10 }
  0xf1   : > { %v349_v13 = vpop.permute.xlu2 %348  ;;  %v353_v27 = vpop.permute.xlu0 %352 }
  0xf2   : > { %v326_v14 = vadd.f32 %v324_v12, %v310_v11  ;;  %464 = vperm.xlu2 %1474, %v1898_v4   ;;  %v355_v22 = vmul.f32 %v349_v13, %v344_v18 }
  0xf4   : > { %v342_v29 = vadd.f32 %v340_v26, %v326_v14 }
  0xf5   : > { %473 = vrot.lane.b32.xlu1 %v1898_v4, %s1704_s19  ;;  %s1748_s19 = smov 70  }
  0xf6   : > { %1477 = vset.pattern.permute.xlu1 %v1711_v15 }
  0xf7   : > { %v328_v16 = vpop.permute.xlu1 %327  ;;  %599 = vrot.lane.b32.xlu0 %v1892_v3, %s1720_s24 }
  0xf8   : > { %1492 = vset.pattern.permute.xlu0 %v1722_v63 }
  0xf9   : > { %v362_v17 = vpop.permute.xlu2 %361  ;;  %v376_v36 = vpop.permute.xlu0 %375 }
  0xfa   : > { %1475 = vset.pattern.permute.xlu2 %v1706_v51  ;;  %v1719_v51 = vmov 21  }
  0xfb   : > { %476 = vperm.xlu2 %1475, %v1892_v3  }
  0xfd   : > { %487 = vrot.lane.b32.xlu1 %v1892_v3, %s1713_s4 }
  0xff   : > { %v333_v19 = vpop.permute.xlu1 %332  ;;  %608 = vperm.xlu0 %1492, %v1898_v4  }
 0x100   : > { %v339_v20 = vmul.f32 %v333_v19, %v328_v16 }
 0x101   : > { %v369_v21 = vpop.permute.xlu2 %368  ;;  %v385_v45 = vpop.permute.xlu0 %384 }
 0x102   : > { %v341_v23 = vadd.f32 %v339_v20, %v325_v6  ;;  %v372_v43 = vmul.f32 %v369_v21, %v362_v17 }
 0x103   : > { %489 = vrot.lane.b32.xlu2 %v1898_v4, %s1713_s4  ;;  %s1760_s4 = smov 64  }
 0x104   : > { %1478 = vset.pattern.permute.xlu2 %v1711_v15  ;;  %v357_v24 = vadd.f32 %v355_v22, %v341_v23  ;;  %v1726_v15 = vmov 26  }
 0x105   : > { %492 = vperm.xlu1 %1477, %v1892_v3  }
 0x107   : > { %v346_v28 = vpop.permute.xlu1 %345  ;;  %631 = vrot.lane.b32.xlu0 %v1892_v3, %s1724_s20 }
 0x108   : > { %v356_v30 = vmul.f32 %v353_v27, %v346_v28  ;;  %1496 = vset.pattern.permute.xlu0 %v1726_v15 }
 0x109   : > { %v408_v54 = vpop.permute.xlu0 %407 }
 0x10a   : > { %v358_v31 = vadd.f32 %v356_v30, %v342_v29  ;;  %v381_v32 = vpop.permute.xlu2 %380 }
 0x10b   : > { %496 = vperm.xlu2 %1478, %v1898_v4   ;;  %v387_v39 = vmul.f32 %v381_v32, %v376_v36 }
 0x10c   : > { %v374_v47 = vadd.f32 %v372_v43, %v358_v31 }
 0x10d   : > { %505 = vrot.lane.b32.xlu1 %v1898_v4, %s1708_s25  ;;  %s1752_s25 = smov 68  }
 0x10e   : > { %1481 = vset.pattern.permute.xlu1 %v1715_v33 }
 0x10f   : > { %v360_v34 = vpop.permute.xlu1 %359  ;;  %640 = vperm.xlu0 %1496, %v1898_v4  }
 0x111   : > { %v417_v61 = vpop.permute.xlu0 %416 }
 0x112   : > { %v394_v35 = vpop.permute.xlu2 %393 }
 0x113   : > { %1479 = vset.pattern.permute.xlu2 %v1710_v7  ;;  %v1723_v7 = vmov 23  }
 0x114   : > { %508 = vperm.xlu2 %1479, %v1892_v3  }
 0x115   : > { %519 = vrot.lane.b32.xlu1 %v1892_v3, %s1717_s7 }
 0x117   : > { %v365_v37 = vpop.permute.xlu1 %364  ;;  %663 = vrot.lane.b32.xlu0 %v1892_v3, %s1727_s9 }
 0x118   : > { %v371_v38 = vmul.f32 %v365_v37, %v360_v34  ;;  %v1730_v34 = vmov 28  }
 0x119   : > { %v440_v10 = vpop.permute.xlu0 %439  ;;  %1500 = vset.pattern.permute.xlu0 %v1730_v34 }
 0x11a   : > { %v373_v40 = vadd.f32 %v371_v38, %v357_v24  ;;  %v401_v41 = vpop.permute.xlu2 %400 }
 0x11b   : > { %v404_v62 = vmul.f32 %v401_v41, %v394_v35 }
 0x11c   : > { %521 = vrot.lane.b32.xlu2 %v1898_v4, %s1717_s7  ;;  %v389_v42 = vadd.f32 %v387_v39, %v373_v40  ;;  %s1763_s7 = smov 62  }
 0x11d   : > { %524 = vperm.xlu1 %1481, %v1892_v3   ;;  %1482 = vset.pattern.permute.xlu2 %v1715_v33 }
 0x11f   : > { %v378_v46 = vpop.permute.xlu1 %377  ;;  %672 = vperm.xlu0 %1500, %v1898_v4  }
 0x120   : > { %v388_v48 = vmul.f32 %v385_v45, %v378_v46 }
 0x121   : > { %v449_v18 = vpop.permute.xlu0 %448 }
 0x122   : > { %v390_v49 = vadd.f32 %v388_v48, %v374_v47 }
 0x123   : > { %v413_v50 = vpop.permute.xlu2 %412 }
 0x124   : > { %528 = vperm.xlu2 %1482, %v1898_v4   ;;  %v419_v57 = vmul.f32 %v413_v50, %v408_v54  ;;  %v406_v1 = vadd.f32 %v404_v62, %v390_v49 }
 0x125   : > { %537 = vrot.lane.b32.xlu1 %v1898_v4, %s1712_s30  ;;  %s1757_s30 = smov 69  }
 0x126   : > { %1485 = vset.pattern.permute.xlu1 %v1719_v51 }
 0x127   : > { %v392_v52 = vpop.permute.xlu1 %391  ;;  %695 = vrot.lane.b32.xlu0 %v1892_v3, %s1731_s11 }
 0x129   : > { %v472_v27 = vpop.permute.xlu0 %471 }
 0x12b   : > { %v426_v53 = vpop.permute.xlu2 %425 }
 0x12c   : > { %1483 = vset.pattern.permute.xlu2 %v1714_v25  ;;  %v1728_v25 = vmov 25  }
 0x12d   : > { %540 = vperm.xlu2 %1483, %v1892_v3   ;;  %551 = vrot.lane.b32.xlu1 %v1892_v3, %s1721_s28 }
 0x12f   : > { %v397_v55 = vpop.permute.xlu1 %396 }
 0x130   : > { %v403_v56 = vmul.f32 %v397_v55, %v392_v52 }
 0x131   : > { %v481_v33 = vpop.permute.xlu0 %480 }
 0x132   : > { %v405_v58 = vadd.f32 %v403_v56, %v389_v42 }
 0x133   : > { %v433_v59 = vpop.permute.xlu2 %432 }
 0x134   : > { %v421_v60 = vadd.f32 %v419_v57, %v405_v58  ;;  %v436_v19 = vmul.f32 %v433_v59, %v426_v53 }
 0x135   : > { %553 = vrot.lane.b32.xlu2 %v1898_v4, %s1721_s28  ;;  %556 = vperm.xlu1 %1485, %v1892_v3   ;;  %s1767_s28 = smov 60  }
 0x136   : > { %1486 = vset.pattern.permute.xlu2 %v1719_v51  ;;  %v1734_v51 = vmov 30  }
 0x137   : > { %v410_v0 = vpop.permute.xlu1 %409  ;;  %1504 = vset.pattern.permute.xlu0 %v1734_v51 }
 0x138   : > { %v420_v2 = vmul.f32 %v417_v61, %v410_v0  ;;  %704 = vperm.xlu0 %1504, %v1898_v4  }
 0x139   : > { %v504_v42 = vpop.permute.xlu0 %503 }
 0x13a   : > { %v422_v5 = vadd.f32 %v420_v2, %v406_v1 }
 0x13c   : > { %v445_v6 = vpop.permute.xlu2 %444  ;;  %v438_v21 = vadd.f32 %v436_v19, %v422_v5  ;;  %v1739_v19 = vmov 31  }
 0x13d   : > { %560 = vperm.xlu2 %1486, %v1898_v4   ;;  %569 = vrot.lane.b32.xlu1 %v1898_v4, %s1716_s6  ;;  %v451_v13 = vmul.f32 %v445_v6, %v440_v10  ;;  %s1761_s6 = smov 67  }
 0x13e   : > { %1489 = vset.pattern.permute.xlu1 %v1723_v7 }
 0x13f   : > { %v424_v8 = vpop.permute.xlu1 %423 }
 0x140   : > { %727 = vrot.lane.b32.xlu0 %v1892_v3, %s1735_s13 }
 0x141   : > { %v513_v53 = vpop.permute.xlu0 %512 }
 0x144   : > { %v458_v9 = vpop.permute.xlu2 %457 }
 0x145   : > { %1487 = vset.pattern.permute.xlu2 %v1718_v44  ;;  %583 = vrot.lane.b32.xlu1 %v1892_v3, %s1725_s29  ;;  %v1732_v44 = vmov 27  }
 0x146   : > { %572 = vperm.xlu2 %1487, %v1892_v3  }
 0x147   : > { %v429_v11 = vpop.permute.xlu1 %428 }
 0x148   : > { %v435_v12 = vmul.f32 %v429_v11, %v424_v8  ;;  %v1738_v11 = vmov 32  }
 0x149   : > { %v536_v62 = vpop.permute.xlu0 %535  ;;  %1508 = vset.pattern.permute.xlu0 %v1738_v11 }
 0x14a   : > { %v437_v14 = vadd.f32 %v435_v12, %v421_v60  ;;  %736 = vperm.xlu0 %1508, %v1898_v4  }
 0x14c   : > { %v465_v16 = vpop.permute.xlu2 %464  ;;  %v453_v17 = vadd.f32 %v451_v13, %v437_v14 }
 0x14d   : > { %588 = vperm.xlu1 %1489, %v1892_v3   ;;  %v468_v37 = vmul.f32 %v465_v16, %v458_v9 }
 0x14e   : > { %585 = vrot.lane.b32.xlu2 %v1898_v4, %s1725_s29  ;;  %s1772_s29 = smov 61  }
 0x14f   : > { %v442_v20 = vpop.permute.xlu1 %441  ;;  %1490 = vset.pattern.permute.xlu2 %v1723_v7 }
 0x150   : > { %v452_v22 = vmul.f32 %v449_v18, %v442_v20 }
 0x151   : > { %v545_v10 = vpop.permute.xlu0 %544 }
 0x152   : > { %v454_v23 = vadd.f32 %v452_v22, %v438_v21  ;;  %759 = vrot.lane.b32.xlu0 %v1892_v3, %s1740_s15 }
 0x154   : > { %v470_v39 = vadd.f32 %v468_v37, %v454_v23 }
 0x155   : > { %v477_v24 = vpop.permute.xlu2 %476  ;;  %601 = vrot.lane.b32.xlu1 %v1898_v4, %s1720_s24  ;;  %s1765_s24 = smov 65  }
 0x156   : > { %592 = vperm.xlu2 %1490, %v1898_v4   ;;  %1493 = vset.pattern.permute.xlu1 %v1728_v25  ;;  %v483_v31 = vmul.f32 %v477_v24, %v472_v27 }
 0x157   : > { %v456_v26 = vpop.permute.xlu1 %455 }
 0x159   : > { %v568_v18 = vpop.permute.xlu0 %567 }
 0x15d   : > { %v490_v28 = vpop.permute.xlu2 %489  ;;  %615 = vrot.lane.b32.xlu1 %v1892_v3, %s1729_s10 }
 0x15e   : > { %1491 = vset.pattern.permute.xlu2 %v1722_v63  ;;  %v1736_v63 = vmov 29  }
 0x15f   : > { %604 = vperm.xlu2 %1491, %v1892_v3   ;;  %v461_v29 = vpop.permute.xlu1 %460 }
 0x160   : > { %v467_v30 = vmul.f32 %v461_v29, %v456_v26  ;;  %v1742_v29 = vmov 34  }
 0x161   : > { %1512 = vset.pattern.permute.xlu0 %v1742_v29 }
 0x162   : > { %v469_v32 = vadd.f32 %v467_v30, %v453_v17  ;;  %768 = vperm.xlu0 %1512, %v1898_v4  }
 0x164   : > { %v485_v35 = vadd.f32 %v483_v31, %v469_v32 }
 0x165   : > { %v497_v36 = vpop.permute.xlu2 %496  ;;  %620 = vperm.xlu1 %1493, %v1892_v3  }
 0x166   : > { %v500_v54 = vmul.f32 %v497_v36, %v490_v28  ;;  %v577_v28 = vpop.permute.xlu0 %576  ;;  %v1743_v36 = vmov 33  }
 0x167   : > { %617 = vrot.lane.b32.xlu2 %v1898_v4, %s1729_s10  ;;  %v474_v38 = vpop.permute.xlu1 %473 }
 0x168   : > { %v484_v40 = vmul.f32 %v481_v33, %v474_v38  ;;  %1494 = vset.pattern.permute.xlu2 %v1728_v25 }
 0x16a   : > { %v486_v41 = vadd.f32 %v484_v40, %v470_v39  ;;  %791 = vrot.lane.b32.xlu0 %v1892_v3, %s1744_s21 }
 0x16c   : > { %v502_v58 = vadd.f32 %v500_v54, %v486_v41  ;;  %v1747_v54 = vmov 35  }
 0x16d   : > { %633 = vrot.lane.b32.xlu1 %v1898_v4, %s1724_s20  ;;  %s1769_s20 = smov 63  }
 0x16e   : > { %v509_v43 = vpop.permute.xlu2 %508  ;;  %1497 = vset.pattern.permute.xlu1 %v1732_v44  ;;  %v600_v38 = vpop.permute.xlu0 %599 }
 0x16f   : > { %624 = vperm.xlu2 %1494, %v1898_v4   ;;  %v488_v45 = vpop.permute.xlu1 %487  ;;  %v515_v46 = vmul.f32 %v509_v43, %v504_v42 }
 0x175   : > { %647 = vrot.lane.b32.xlu1 %v1892_v3, %s1733_s12 }
 0x176   : > { %v522_v47 = vpop.permute.xlu2 %521 }
 0x177   : > { %1495 = vset.pattern.permute.xlu2 %v1726_v15  ;;  %v493_v48 = vpop.permute.xlu1 %492 }
 0x178   : > { %v499_v49 = vmul.f32 %v493_v48, %v488_v45  ;;  %636 = vperm.xlu2 %1495, %v1892_v3  }
 0x17a   : > { %v501_v50 = vadd.f32 %v499_v49, %v485_v35 }
 0x17c   : > { %v517_v52 = vadd.f32 %v515_v46, %v501_v50  ;;  %v609_v46 = vpop.permute.xlu0 %608 }
 0x17d   : > { %652 = vperm.xlu1 %1497, %v1892_v3  }
 0x17e   : > { %v529_v55 = vpop.permute.xlu2 %528 }
 0x17f   : > { %v532_v56 = vmul.f32 %v529_v55, %v522_v47  ;;  %v506_v57 = vpop.permute.xlu1 %505  ;;  %v1746_v47 = vmov 36  }
 0x180   : > { %v516_v59 = vmul.f32 %v513_v53, %v506_v57  ;;  %649 = vrot.lane.b32.xlu2 %v1898_v4, %s1733_s12  ;;  %1516 = vset.pattern.permute.xlu0 %v1746_v47 }
 0x181   : > { %1498 = vset.pattern.permute.xlu2 %v1732_v44  ;;  %800 = vperm.xlu0 %1516, %v1898_v4  }
 0x182   : > { %v518_v60 = vadd.f32 %v516_v59, %v502_v58 }
 0x184   : > { %v534_v61 = vadd.f32 %v532_v56, %v518_v60  ;;  %v632_v56 = vpop.permute.xlu0 %631 }
 0x185   : > { %665 = vrot.lane.b32.xlu1 %v1898_v4, %s1727_s9  ;;  %s2158_s9 = sld [smem:[#allocation3 + %s1817_s0]]  ;;  %s2218_s0 = smov (!%p187_p1, %s1817_s0), 1 }
 0x186   : > { %1501 = vset.pattern.permute.xlu1 %v1736_v63  ;;  %s1270_s10 = sshll.u32 %s2218_s0, 4 }
 0x187   : > { %v541_v0 = vpop.permute.xlu2 %540  ;;  %v520_v1 = vpop.permute.xlu1 %519 }
 0x188   : > { %656 = vperm.xlu2 %1498, %v1898_v4   ;;  %v547_v2 = vmul.f32 %v541_v0, %v536_v62 }
 0x189   : > { %823 = vrot.lane.b32.xlu0 %v1892_v3, %s1748_s19 }
 0x18b   : > { %s1099_s0 = scvt.s32.f32 %s2158_s9 }
 0x18c   : > { %v641_v0 = vpop.permute.xlu0 %640 }
 0x18d   : > { %679 = vrot.lane.b32.xlu1 %v1892_v3, %s1737_s14 }
 0x18f   : > { %v554_v5 = vpop.permute.xlu2 %553  ;;  %v525_v6 = vpop.permute.xlu1 %524 }
 0x190   : > { %v531_v7 = vmul.f32 %v525_v6, %v520_v1  ;;  %1499 = vset.pattern.permute.xlu2 %v1730_v34  ;;  %v1750_v1 = vmov 38  }
 0x191   : > { %668 = vperm.xlu2 %1499, %v1892_v3   ;;  %1520 = vset.pattern.permute.xlu0 %v1750_v1 }
 0x192   : > { %v533_v8 = vadd.f32 %v531_v7, %v517_v52  ;;  %832 = vperm.xlu0 %1520, %v1898_v4  }
 0x194   : > { %v549_v9 = vadd.f32 %v547_v2, %v533_v8 }
 0x195   : > { %684 = vperm.xlu1 %1501, %v1892_v3  }
 0x197   : > { %v561_v12 = vpop.permute.xlu2 %560  ;;  %v538_v13 = vpop.permute.xlu1 %537 }
 0x198   : > { %v564_v14 = vmul.f32 %v561_v12, %v554_v5  ;;  %v548_v15 = vmul.f32 %v545_v10, %v538_v13  ;;  %v2074_v10 = vld [vmem:[%s1885_s8] sm:$0xff]  ;;  %v664_v12 = vpop.permute.xlu0 %663 }
 0x199   : > { %681 = vrot.lane.b32.xlu2 %v1898_v4, %s1737_s14  ;;  %s1774_s14 = smov 1.0  }
 0x19a   : > { %v550_v16 = vadd.f32 %v548_v15, %v534_v61  ;;  %1502 = vset.pattern.permute.xlu2 %v1736_v63  ;;  %855 = vrot.lane.b32.xlu0 %v2074_v10, %s1752_s25 }
 0x19c   : > { %v566_v17 = vadd.f32 %v564_v14, %v550_v16  ;;  %v2079_v14 = vld [vmem:[%s1885_s8 + $0x8] sm:$0xff]  ;;  %s1756_s8 = smov 66  }
 0x19d   : > { %697 = vrot.lane.b32.xlu1 %v1898_v4, %s1731_s11 }
 0x19e   : > { %1505 = vset.pattern.permute.xlu1 %v1739_v19 }
 0x19f   : > { %v552_v20 = vpop.permute.xlu1 %551 }
 0x1a0   : > { %v573_v21 = vpop.permute.xlu2 %572 }
 0x1a1   : > { %688 = vperm.xlu2 %1502, %v1898_v4   ;;  %v579_v22 = vmul.f32 %v573_v21, %v568_v18  ;;  %v1754_v21 = vmov 40  }
 0x1a2   : > { %1524 = vset.pattern.permute.xlu0 %v1754_v21 }
 0x1a3   : > { %864 = vperm.xlu0 %1524, %v2079_v14  }
 0x1a5   : > { %711 = vrot.lane.b32.xlu1 %v1892_v3, %s1741_s16 }
 0x1a7   : > { %v557_v23 = vpop.permute.xlu1 %556 }
 0x1a8   : > { %v563_v24 = vmul.f32 %v557_v23, %v552_v20  ;;  %v586_v25 = vpop.permute.xlu2 %585  ;;  %v673_v20 = vpop.permute.xlu0 %672 }
 0x1a9   : > { %1503 = vset.pattern.permute.xlu2 %v1734_v51 }
 0x1aa   : > { %v565_v26 = vadd.f32 %v563_v24, %v549_v9  ;;  %700 = vperm.xlu2 %1503, %v1892_v3  }
 0x1ab   : > { %887 = vrot.lane.b32.xlu0 %v2074_v10, %s1756_s8 }
 0x1ac   : > { %v581_v27 = vadd.f32 %v579_v22, %v565_v26 }
 0x1ad   : > { %716 = vperm.xlu1 %1505, %v1892_v3  }
 0x1af   : > { %v570_v30 = vpop.permute.xlu1 %569 }
 0x1b0   : > { %v580_v31 = vmul.f32 %v577_v28, %v570_v30  ;;  %v593_v32 = vpop.permute.xlu2 %592  ;;  %v1755_v28 = vmov 39   ;;  %v696_v30 = vpop.permute.xlu0 %695 }
 0x1b1   : > { %v596_v33 = vmul.f32 %v593_v32, %v586_v25 }
 0x1b2   : > { %v582_v34 = vadd.f32 %v580_v31, %v566_v17  ;;  %713 = vrot.lane.b32.xlu2 %v1898_v4, %s1741_s16 }
 0x1b3   : > { %1506 = vset.pattern.permute.xlu2 %v1739_v19 }
 0x1b4   : > { %v598_v35 = vadd.f32 %v596_v33, %v582_v34 }
 0x1b5   : > { %729 = vrot.lane.b32.xlu1 %v1898_v4, %s1735_s13  ;;  %s2166_s13 = scalar_lea.vmem %s2209_s3, %s1270_s10 }
 0x1b6   : > { %1509 = vset.pattern.permute.xlu1 %v1743_v36 }
 0x1b7   : > { %v584_v37 = vpop.permute.xlu1 %583 }
 0x1b9   : > { %v605_v39 = vpop.permute.xlu2 %604 }
 0x1ba   : > { %720 = vperm.xlu2 %1506, %v1898_v4   ;;  %v611_v40 = vmul.f32 %v605_v39, %v600_v38  ;;  %v1758_v39 = vmov 42  }
 0x1bb   : > { %1528 = vset.pattern.permute.xlu0 %v1758_v39 }
 0x1bc   : > { %896 = vperm.xlu0 %1528, %v2079_v14  }
 0x1bd   : > { %743 = vrot.lane.b32.xlu1 %v1892_v3, %s1745_s22 }
 0x1bf   : > { %v589_v41 = vpop.permute.xlu1 %588 }
 0x1c0   : > { %v595_v42 = vmul.f32 %v589_v41, %v584_v37  ;;  %v211_v41 = vld [vmem:[#allocation4 + $0x70] sm:$0xff] }
 0x1c1   : > { %v618_v43 = vpop.permute.xlu2 %617 }
 0x1c2   : > { %v597_v44 = vadd.f32 %v595_v42, %v581_v27  ;;  %1507 = vset.pattern.permute.xlu2 %v1738_v11 }
 0x1c3   : > { %732 = vperm.xlu2 %1507, %v1892_v3  }
 0x1c4   : > { %v613_v45 = vadd.f32 %v611_v40, %v597_v44  ;;  %v705_v40 = vpop.permute.xlu0 %704  ;;  %v210_v44 = vld [vmem:[#allocation4 + $0x68] sm:$0xff]  ;;  %919 = vrot.lane.b32.xlu0 %v2074_v10, %s1760_s4 }
 0x1c5   : > { %748 = vperm.xlu1 %1509, %v1892_v3  }
 0x1c7   : > { %v602_v48 = vpop.permute.xlu1 %601 }
 0x1c8   : > { %v612_v49 = vmul.f32 %v609_v46, %v602_v48 }
 0x1c9   : > { %v625_v50 = vpop.permute.xlu2 %624 }
 0x1ca   : > { %v614_v51 = vadd.f32 %v612_v49, %v598_v35  ;;  %v628_v52 = vmul.f32 %v625_v50, %v618_v43  ;;  %v207_v50 = vld [vmem:[#allocation4 + $0x50] sm:$0xff] }
 0x1cb   : > { %745 = vrot.lane.b32.xlu2 %v1898_v4, %s1745_s22 }
 0x1cc   : > { %v630_v53 = vadd.f32 %v628_v52, %v614_v51  ;;  %1510 = vset.pattern.permute.xlu2 %v1743_v36  ;;  %v212_v36 = vld [vmem:[#allocation4 + $0x78] sm:$0xff]  ;;  %v1759_v51 = vmov 41  }
 0x1cd   : > { %761 = vrot.lane.b32.xlu1 %v1898_v4, %s1740_s15  ;;  %1001 = vmatpush.msra.mxu0 %v212_v36  ;;  %s1100_s15 = smax.f32 %s1774_s14, %s1099_s0 }
 0x1ce   : > { %1513 = vset.pattern.permute.xlu1 %v1747_v54  ;;  %1271 = vmatpush.msra.mxu1 %v212_v36  ;;  %v1768_v36 = vmov 45  }
 0x1cf   : > { %v616_v55 = vpop.permute.xlu1 %615  ;;  %1002 = vmatpush.msra.mxu0 %v211_v41 }
 0x1d0   : > { %1272 = vmatpush.msra.mxu1 %v211_v41 }
 0x1d1   : > { %1003 = vmatpush.msra.mxu0 %v210_v44 }
 0x1d2   : > { %v637_v57 = vpop.permute.xlu2 %636  ;;  %1273 = vmatpush.msra.mxu1 %v210_v44 }
 0x1d3   : > { %752 = vperm.xlu2 %1510, %v1898_v4   ;;  %v643_v58 = vmul.f32 %v637_v57, %v632_v56  ;;  %v728_v56 = vpop.permute.xlu0 %727  ;;  %v204_v57 = vld [vmem:[#allocation4 + $0x38] sm:$0xff] }
 0x1d5   : > { %775 = vrot.lane.b32.xlu1 %v1892_v3, %s1749_s23 }
 0x1d7   : > { %v621_v59 = vpop.permute.xlu1 %620 }
 0x1d8   : > { %v627_v60 = vmul.f32 %v621_v59, %v616_v55  ;;  %v205_v55 = vld [vmem:[#allocation4 + $0x40] sm:$0xff]  ;;  %v203_v59 = vld [vmem:[#allocation4 + $0x30] sm:$0xff] }
 0x1da   : > { %v629_v61 = vadd.f32 %v627_v60, %v613_v45  ;;  %v650_v62 = vpop.permute.xlu2 %649  ;;  %v209_v45 = vld [vmem:[#allocation4 + $0x60] sm:$0xff] }
 0x1db   : > { %1511 = vset.pattern.permute.xlu2 %v1742_v29  ;;  %1004 = vmatpush.msra.mxu0 %v209_v45 }
 0x1dc   : > { %764 = vperm.xlu2 %1511, %v1892_v3   ;;  %v645_v63 = vadd.f32 %v643_v58, %v629_v61  ;;  %1274 = vmatpush.msra.mxu1 %v209_v45 }
 0x1dd   : > { %780 = vperm.xlu1 %1513, %v1892_v3   ;;  %v1751_v3 = vmov 37  }
 0x1df   : > { %v634_v2 = vpop.permute.xlu1 %633 }
 0x1e0   : > { %v644_v5 = vmul.f32 %v641_v0, %v634_v2  ;;  %v200_v2 = vld [vmem:[#allocation4 + $0x18] sm:$0xff] }
 0x1e2   : > { %v646_v6 = vadd.f32 %v644_v5, %v630_v53  ;;  %v657_v7 = vpop.permute.xlu2 %656  ;;  %v1762_v5 = vmov 44  }
 0x1e3   : > { %v660_v8 = vmul.f32 %v657_v7, %v650_v62  ;;  %1532 = vset.pattern.permute.xlu0 %v1762_v5 }
 0x1e4   : > { %777 = vrot.lane.b32.xlu2 %v1898_v4, %s1749_s23  ;;  %928 = vperm.xlu0 %1532, %v2079_v14  }
 0x1e5   : > { %v662_v9 = vadd.f32 %v660_v8, %v646_v6  ;;  %793 = vrot.lane.b32.xlu1 %v1898_v4, %s1744_s21  ;;  %1514 = vset.pattern.permute.xlu2 %v1747_v54  ;;  %v206_v54 = vld [vmem:[#allocation4 + $0x48] sm:$0xff]  ;;  %v737_v8 = vpop.permute.xlu0 %736 }
 0x1e6   : > { %1517 = vset.pattern.permute.xlu1 %v1751_v3 }
 0x1e7   : > { %v648_v11 = vpop.permute.xlu1 %647 }
 0x1eb   : > { %v669_v13 = vpop.permute.xlu2 %668 }
 0x1ec   : > { %784 = vperm.xlu2 %1514, %v2079_v14   ;;  %v675_v15 = vmul.f32 %v669_v13, %v664_v12  ;;  %v198_v12 = vld [vmem:[#allocation4 + $0x8] sm:$0xff]  ;;  %v197_v13 = vld [vmem:[#allocation4] sm:$0xff]  ;;  %951 = vrot.lane.b32.xlu0 %v2074_v10, %s1763_s7 }
 0x1ed   : > { %807 = vrot.lane.b32.xlu1 %v2074_v10, %s1753_s26 }
 0x1ef   : > { %v653_v4 = vpop.permute.xlu1 %652 }
 0x1f0   : > { %v659_v16 = vmul.f32 %v653_v4, %v648_v11  ;;  %v195_v4 = vmul.f32 %v2074_v10, %v2074_v10 }
 0x1f2   : > { %v661_v17 = vadd.f32 %v659_v16, %v645_v63  ;;  %v202_v63 = vld [vmem:[#allocation4 + $0x28] sm:$0xff]  ;;  %v196_v16 = vmul.f32 %v2079_v14, %v2079_v14 }
 0x1f3   : > { %v682_v18 = vpop.permute.xlu2 %681 }
 0x1f4   : > { %1515 = vset.pattern.permute.xlu2 %v1746_v47  ;;  %v677_v19 = vadd.f32 %v675_v15, %v661_v17  ;;  %v208_v47 = vld [vmem:[#allocation4 + $0x58] sm:$0xff] }
 0x1f5   : > { %796 = vperm.xlu2 %1515, %v2074_v10   ;;  %812 = vperm.xlu1 %1517, %v2074_v10  }
 0x1f6   : > { %1005 = vmatpush.msra.mxu0 %v208_v47  ;;  %1275 = vmatpush.msra.mxu1 %v208_v47 }
 0x1f7   : > { %v666_v22 = vpop.permute.xlu1 %665 }
 0x1f8   : > { %v676_v23 = vmul.f32 %v673_v20, %v666_v22  ;;  %1006 = vmatpush.msra.mxu0 %v207_v50  ;;  %1276 = vmatpush.msra.mxu1 %v207_v50  ;;  %v760_v22 = vpop.permute.xlu0 %759 }
 0x1fa   : > { %v678_v24 = vadd.f32 %v676_v23, %v662_v9  ;;  %1007 = vmatpush.msra.mxu0 %v206_v54  ;;  %1277 = vmatpush.msra.mxu1 %v206_v54  ;;  %v199_v9 = vld [vmem:[#allocation4 + $0x10] sm:$0xff] }
 0x1fb   : > { %v689_v25 = vpop.permute.xlu2 %688 }
 0x1fc   : > { %v692_v26 = vmul.f32 %v689_v25, %v682_v18  ;;  %1008 = vmatpush.msra.mxu0 %v205_v55  ;;  %1278 = vmatpush.msra.mxu1 %v205_v55 }
 0x1fd   : > { %809 = vrot.lane.b32.xlu2 %v2079_v14, %s1753_s26  ;;  %825 = vrot.lane.b32.xlu1 %v2079_v14, %s1748_s19 }
 0x1fe   : > { %v694_v27 = vadd.f32 %v692_v26, %v678_v24  ;;  %1518 = vset.pattern.permute.xlu2 %v1751_v3  ;;  %1521 = vset.pattern.permute.xlu1 %v1755_v28 }
 0x1ff   : > { %v680_v29 = vpop.permute.xlu1 %679  ;;  %1009 = vmatpush.msra.mxu0 %v204_v57  ;;  %1279 = vmatpush.msra.mxu1 %v204_v57 }
 0x201   : > { %1010 = vmatpush.msra.mxu0 %v203_v59  ;;  %1280 = vmatpush.msra.mxu1 %v203_v59 }
 0x203   : > { %1011 = vmatpush.msra.mxu0 %v202_v63  ;;  %1281 = vmatpush.msra.mxu1 %v202_v63 }
 0x204   : > { %v701_v31 = vpop.permute.xlu2 %700 }
 0x205   : > { %816 = vperm.xlu2 %1518, %v2079_v14   ;;  %839 = vrot.lane.b32.xlu1 %v2074_v10, %s1757_s30  ;;  %v707_v32 = vmul.f32 %v701_v31, %v696_v30  ;;  %v769_v30 = vpop.permute.xlu0 %768 }
 0x207   : > { %v685_v33 = vpop.permute.xlu1 %684 }
 0x208   : > { %v691_v34 = vmul.f32 %v685_v33, %v680_v29 }
 0x20a   : > { %v693_v35 = vadd.f32 %v691_v34, %v677_v19  ;;  %v1764_v19 = vmov 43  }
 0x20c   : > { %v714_v37 = vpop.permute.xlu2 %713  ;;  %v709_v38 = vadd.f32 %v707_v32, %v693_v35 }
 0x20d   : > { %1519 = vset.pattern.permute.xlu2 %v1750_v1  ;;  %844 = vperm.xlu1 %1521, %v2074_v10   ;;  %v201_v1 = vld [vmem:[#allocation4 + $0x20] sm:$0xff] }
 0x20e   : > { %828 = vperm.xlu2 %1519, %v2074_v10   ;;  %1012 = vmatpush.msra.mxu0 %v201_v1 }
 0x20f   : > { %v698_v42 = vpop.permute.xlu1 %697  ;;  %1282 = vmatpush.msra.mxu1 %v201_v1 }
 0x210   : > { %v708_v43 = vmul.f32 %v705_v40, %v698_v42  ;;  %1013 = vmatpush.msra.mxu0 %v200_v2  ;;  %v792_v40 = vpop.permute.xlu0 %791 }
 0x211   : > { %1283 = vmatpush.msra.mxu1 %v200_v2 }
 0x212   : > { %v710_v46 = vadd.f32 %v708_v43, %v694_v27  ;;  %1014 = vmatpush.msra.mxu0 %v199_v9 }
 0x213   : > { %1284 = vmatpush.msra.mxu1 %v199_v9 }
 0x214   : > { %v721_v48 = vpop.permute.xlu2 %720  ;;  %1015 = vmatpush.msra.mxu0 %v198_v12 }
 0x215   : > { %v724_v49 = vmul.f32 %v721_v48, %v714_v37  ;;  %857 = vrot.lane.b32.xlu1 %v2079_v14, %s1752_s25  ;;  %1285 = vmatpush.msra.mxu1 %v198_v12 }
 0x216   : > { %841 = vrot.lane.b32.xlu2 %v2079_v14, %s1757_s30  ;;  %1525 = vset.pattern.permute.xlu1 %v1759_v51 }
 0x217   : > { %v726_v52 = vadd.f32 %v724_v49, %v710_v46  ;;  %v712_v53 = vpop.permute.xlu1 %711  ;;  %1522 = vset.pattern.permute.xlu2 %v1755_v28  ;;  %1016 = vmatpush.msra.mxu0 %v197_v13  ;;  %v1766_v28 = vmov 46   ;;  %v1770_v46 = vmov 48  }
 0x218   : > { %1286 = vmatpush.msra.mxu1 %v197_v13  ;;  %1017 = vmatmul.f32.vlgmr.msra.gmra.mxu0 %v195_v4  ;;  %v801_v48 = vpop.permute.xlu0 %800 }
 0x219   : > { %1020 = vmatmul.f32.vlgmr.msra.gmra.mxu1 %v196_v16  ;;  %1536 = vset.pattern.permute.xlu0 %v1766_v28 }
 0x21a   : > { %960 = vperm.xlu0 %1536, %v2079_v14  }
 0x21d   : > { %v733_v58 = vpop.permute.xlu2 %732  ;;  %871 = vrot.lane.b32.xlu1 %v2074_v10, %s1761_s6 }
 0x21e   : > { %848 = vperm.xlu2 %1522, %v2079_v14   ;;  %v739_v60 = vmul.f32 %v733_v58, %v728_v56 }
 0x21f   : > { %v717_v61 = vpop.permute.xlu1 %716 }
 0x220   : > { %v723_v62 = vmul.f32 %v717_v61, %v712_v53  ;;  %v1771_v53 = vmov 47   ;;  %v824_v58 = vpop.permute.xlu0 %823 }
 0x222   : > { %v725_v0 = vadd.f32 %v723_v62, %v709_v38  ;;  %983 = vrot.lane.b32.xlu0 %v2074_v10, %s1767_s28 }
 0x223   : > { %1540 = vset.pattern.permute.xlu0 %v1770_v46 }
 0x224   : > { %v741_v6 = vadd.f32 %v739_v60, %v725_v0 }
 0x225   : > { %v746_v7 = vpop.permute.xlu2 %745  ;;  %876 = vperm.xlu1 %1525, %v2074_v10  }
 0x226   : > { %1523 = vset.pattern.permute.xlu2 %v1754_v21 }
 0x227   : > { %860 = vperm.xlu2 %1523, %v2074_v10   ;;  %v730_v3 = vpop.permute.xlu1 %729 }
 0x228   : > { %v740_v11 = vmul.f32 %v737_v8, %v730_v3  ;;  %v833_v1 = vpop.permute.xlu0 %832 }
 0x22a   : > { %v742_v15 = vadd.f32 %v740_v11, %v726_v52  ;;  %992 = vperm.xlu0 %1540, %v2079_v14  }
 0x22d   : > { %v753_v17 = vpop.permute.xlu2 %752  ;;  %889 = vrot.lane.b32.xlu1 %v2079_v14, %s1756_s8 }
 0x22e   : > { %v756_v18 = vmul.f32 %v753_v17, %v746_v7  ;;  %1529 = vset.pattern.permute.xlu1 %v1764_v19 }
 0x22f   : > { %873 = vrot.lane.b32.xlu2 %v2079_v14, %s1761_s6  ;;  %v744_v20 = vpop.permute.xlu1 %743 }
 0x230   : > { %v758_v21 = vadd.f32 %v756_v18, %v742_v15  ;;  %1526 = vset.pattern.permute.xlu2 %v1759_v51  ;;  %v856_v12 = vpop.permute.xlu0 %855 }
 0x235   : > { %903 = vrot.lane.b32.xlu1 %v2074_v10, %s1765_s24 }
 0x236   : > { %v765_v23 = vpop.permute.xlu2 %764 }
 0x237   : > { %880 = vperm.xlu2 %1526, %v2079_v14   ;;  %v749_v24 = vpop.permute.xlu1 %748  ;;  %v771_v25 = vmul.f32 %v765_v23, %v760_v22 }
 0x238   : > { %v755_v26 = vmul.f32 %v749_v24, %v744_v20 }
 0x23a   : > { %v757_v27 = vadd.f32 %v755_v26, %v741_v6 }
 0x23c   : > { %v773_v29 = vadd.f32 %v771_v25, %v757_v27 }
 0x23d   : > { %908 = vperm.xlu1 %1529, %v2074_v10  }
 0x23e   : > { %v778_v31 = vpop.permute.xlu2 %777 }
 0x23f   : > { %1527 = vset.pattern.permute.xlu2 %v1758_v39  ;;  %v762_v32 = vpop.permute.xlu1 %761 }
 0x240   : > { %v772_v33 = vmul.f32 %v769_v30, %v762_v32  ;;  %892 = vperm.xlu2 %1527, %v2074_v10  }
 0x242   : > { %v774_v34 = vadd.f32 %v772_v33, %v758_v21 }
 0x245   : > { %921 = vrot.lane.b32.xlu1 %v2079_v14, %s1760_s4 }
 0x246   : > { %v785_v35 = vpop.permute.xlu2 %784  ;;  %1533 = vset.pattern.permute.xlu1 %v1768_v36 }
 0x247   : > { %v788_v37 = vmul.f32 %v785_v35, %v778_v31  ;;  %v776_v38 = vpop.permute.xlu1 %775 }
 0x248   : > { %905 = vrot.lane.b32.xlu2 %v2079_v14, %s1765_s24 }
 0x249   : > { %v790_v39 = vadd.f32 %v788_v37, %v774_v34  ;;  %1530 = vset.pattern.permute.xlu2 %v1764_v19  ;;  %v865_v19 = vpop.permute.xlu0 %864 }
 0x24d   : > { %935 = vrot.lane.b32.xlu1 %v2074_v10, %s1769_s20 }
 0x24f   : > { %v797_v41 = vpop.permute.xlu2 %796  ;;  %v781_v42 = vpop.permute.xlu1 %780 }
 0x250   : > { %v787_v43 = vmul.f32 %v781_v42, %v776_v38  ;;  %v803_v44 = vmul.f32 %v797_v41, %v792_v40  ;;  %912 = vperm.xlu2 %1530, %v2079_v14  }
 0x252   : > { %v789_v45 = vadd.f32 %v787_v43, %v773_v29 }
 0x254   : > { %v805_v47 = vadd.f32 %v803_v44, %v789_v45 }
 0x255   : > { %940 = vperm.xlu1 %1533, %v2074_v10  }
 0x257   : > { %v810_v49 = vpop.permute.xlu2 %809  ;;  %v794_v50 = vpop.permute.xlu1 %793 }
 0x258   : > { %v804_v51 = vmul.f32 %v801_v48, %v794_v50  ;;  %1531 = vset.pattern.permute.xlu2 %v1762_v5 }
 0x259   : > { %924 = vperm.xlu2 %1531, %v2074_v10  }
 0x25a   : > { %v806_v52 = vadd.f32 %v804_v51, %v790_v39 }
 0x25d   : > { %953 = vrot.lane.b32.xlu1 %v2079_v14, %s1763_s7 }
 0x25e   : > { %1537 = vset.pattern.permute.xlu1 %v1771_v53 }
 0x25f   : > { %v817_v54 = vpop.permute.xlu2 %816  ;;  %v808_v55 = vpop.permute.xlu1 %807 }
 0x260   : > { %v820_v56 = vmul.f32 %v817_v54, %v810_v49 }
 0x261   : > { %937 = vrot.lane.b32.xlu2 %v2079_v14, %s1769_s20 }
 0x262   : > { %v822_v57 = vadd.f32 %v820_v56, %v806_v52  ;;  %1534 = vset.pattern.permute.xlu2 %v1768_v36 }
 0x265   : > { %967 = vrot.lane.b32.xlu1 %v2074_v10, %s1772_s29 }
 0x267   : > { %v813_v59 = vpop.permute.xlu1 %812 }
 0x268   : > { %v819_v60 = vmul.f32 %v813_v59, %v808_v55  ;;  %v829_v61 = vpop.permute.xlu2 %828 }
 0x269   : > { %v835_v62 = vmul.f32 %v829_v61, %v824_v58  ;;  %944 = vperm.xlu2 %1534, %v2079_v14  }
 0x26a   : > { %v821_v63 = vadd.f32 %v819_v60, %v805_v47 }
 0x26c   : > { %v837_v0 = vadd.f32 %v835_v62, %v821_v63 }
 0x26d   : > { %972 = vperm.xlu1 %1537, %v2074_v10  }
 0x26f   : > { %v826_v2 = vpop.permute.xlu1 %825 }
 0x270   : > { %v836_v5 = vmul.f32 %v833_v1, %v826_v2  ;;  %v842_v6 = vpop.permute.xlu2 %841 }
 0x271   : > { %1535 = vset.pattern.permute.xlu2 %v1766_v28 }
 0x272   : > { %v838_v7 = vadd.f32 %v836_v5, %v822_v57  ;;  %956 = vperm.xlu2 %1535, %v2074_v10  }
 0x275   : > { %985 = vrot.lane.b32.xlu1 %v2079_v14, %s1767_s28 }
 0x277   : > { %v840_v8 = vpop.permute.xlu1 %839 }
 0x278   : > { %v849_v9 = vpop.permute.xlu2 %848 }
 0x279   : > { %v852_v3 = vmul.f32 %v849_v9, %v842_v6 }
 0x27a   : > { %969 = vrot.lane.b32.xlu2 %v2079_v14, %s1772_s29 }
 0x27b   : > { %v854_v11 = vadd.f32 %v852_v3, %v838_v7  ;;  %1538 = vset.pattern.permute.xlu2 %v1771_v53 }
 0x27f   : > { %v845_v13 = vpop.permute.xlu1 %844 }
 0x280   : > { %v851_v15 = vmul.f32 %v845_v13, %v840_v8 }
 0x281   : > { %v861_v4 = vpop.permute.xlu2 %860 }
 0x282   : > { %v853_v16 = vadd.f32 %v851_v15, %v837_v0  ;;  %v867_v17 = vmul.f32 %v861_v4, %v856_v12  ;;  %976 = vperm.xlu2 %1538, %v2079_v14   ;;  %v888_v14 = vpop.permute.xlu0 %887 }
 0x284   : > { %v869_v18 = vadd.f32 %v867_v17, %v853_v16 }
 0x287   : > { %v858_v20 = vpop.permute.xlu1 %857 }
 0x288   : > { %v868_v21 = vmul.f32 %v865_v19, %v858_v20  ;;  %v999_v19 = vlaneseq }
 0x289   : > { %v874_v22 = vpop.permute.xlu2 %873 }
 0x28a   : > { %v870_v23 = vadd.f32 %v868_v21, %v854_v11  ;;  %1539 = vset.pattern.permute.xlu2 %v1770_v46  ;;  %v897_v36 = vpop.permute.xlu0 %896 }
 0x28b   : > { %988 = vperm.xlu2 %1539, %v2074_v10  }
 0x28f   : > { %v872_v24 = vpop.permute.xlu1 %871 }
 0x291   : > { %v881_v25 = vpop.permute.xlu2 %880 }
 0x292   : > { %v884_v26 = vmul.f32 %v881_v25, %v874_v22  ;;  %v920_v39 = vpop.permute.xlu0 %919 }
 0x294   : > { %v886_v27 = vadd.f32 %v884_v26, %v870_v23 }
 0x295   : > { %v1018_v44 = vpop.f32.mrf.mxu0 }
 0x296   : > { %v1021_v46 = vpop.f32.mrf.mxu1  ;;  %v1019_v47 = vadd.f32 1e-09, %v1018_v44 }
 0x297   : > { %v877_v28 = vpop.permute.xlu1 %876  ;;  %v1022_v49 = vadd.f32 1e-09, %v1021_v46 }
 0x298   : > { %v883_v29 = vmul.f32 %v877_v28, %v872_v24  ;;  %1541 = vrsqrt.f32 %v1019_v47  ;;  %vm1030_vm0 = vweird.f32 %v1019_v47 }
 0x299   : > { %1543 = vrsqrt.f32 %v1022_v49  ;;  %vm1040_vm2 = vweird.f32 %v1022_v49 }
 0x29a   : > { %v885_v30 = vadd.f32 %v883_v29, %v869_v18  ;;  %v893_v31 = vpop.permute.xlu2 %892  ;;  %v929_v42 = vpop.permute.xlu0 %928 }
 0x29b   : > { %v899_v59 = vmul.f32 %v893_v31, %v888_v14 }
 0x29d   : > { %v901_v1 = vadd.f32 %v899_v59, %v885_v30  ;;  %v1000_v30 = vand.u32 127, %v999_v19 }
 0x29e   : > { %v1542_v52 = vpop.eup %1541 }
 0x29f   : > { %v890_v32 = vpop.permute.xlu1 %889  ;;  %v1544_v54 = vpop.eup %1543  ;;  %v1025_v56 = vmul.f32 %v1542_v52, %v1019_v47  ;;  %vm1031_vm1 = vweird.f32 %v1542_v52  ;;  %vm1046_vm6 = vcmp.lt.s32.totalorder %v1000_v30, 60 }
 0x2a0   : > { %v1035_v57 = vmul.f32 %v1544_v54, %v1022_v49  ;;  %v900_v61 = vmul.f32 %v897_v36, %v890_v32  ;;  %vm1041_vm3 = vweird.f32 %v1544_v54  ;;  %vm1032_vm4 = vmor %vm1030_vm0, %vm1031_vm1 }
 0x2a1   : > { %v1026_v60 = vmul.f32 %v1542_v52, %v1025_v56  ;;  %vm1042_vm5 = vmor %vm1040_vm2, %vm1041_vm3 }
 0x2a2   : > { %v906_v33 = vpop.permute.xlu2 %905  ;;  %v952_v48 = vpop.permute.xlu0 %951  ;;  %v1036_v63 = vmul.f32 %v1544_v54, %v1035_v57  ;;  %v902_v8 = vadd.f32 %v900_v61, %v886_v27 }
 0x2a3   : > { %v1027_v7 = vmul.f32 0.5, %v1026_v60  ;;  %v1773_v60 = vmov 0.0  }
 0x2a4   : > { %v1037_v12 = vmul.f32 0.5, %v1036_v63 }
 0x2a5   : > { %v1028_v18 = vsub.f32 1.5, %v1027_v7 }
 0x2a6   : > { %v1038_v24 = vsub.f32 1.5, %v1037_v12 }
 0x2a7   : > { %v904_v34 = vpop.permute.xlu1 %903  ;;  %v1029_v31 = vmul.f32 %v1542_v52, %v1028_v18 }
 0x2aa   : > { %v913_v35 = vpop.permute.xlu2 %912  ;;  %v961_v53 = vpop.permute.xlu0 %960 }
 0x2ab   : > { %v916_v2 = vmul.f32 %v913_v35, %v906_v33  ;;  %v1039_v35 = vmul.f32 %v1544_v54, %v1038_v24 }
 0x2ad   : > { %v918_v15 = vadd.f32 %v916_v2, %v902_v8 }
 0x2af   : > { %v909_v37 = vpop.permute.xlu1 %908 }
 0x2b0   : > { %v915_v62 = vmul.f32 %v909_v37, %v904_v34 }
 0x2b2   : > { %v984_v0 = vpop.permute.xlu0 %983  ;;  %v917_v9 = vadd.f32 %v915_v62, %v901_v1 }
 0x2b3   : > { %v925_v38 = vpop.permute.xlu2 %924 }
 0x2b4   : > { %v931_v5 = vmul.f32 %v925_v38, %v920_v39  ;;  %v1033_v39 = vsel %vm1032_vm4, %v1542_v52, %v1029_v31  ;;  %v1074_v52 = vshrl.u32 %v999_v19, 7 }
 0x2b6   : > { %v933_v4 = vadd.f32 %v931_v5, %v917_v9  ;;  %v1075_v56 = vadd.s32 8, %v1074_v52 }
 0x2b7   : > { %v922_v40 = vpop.permute.xlu1 %921 }
 0x2b8   : > { %v932_v3 = vmul.f32 %v929_v42, %v922_v40 }
 0x2ba   : > { %v934_v20 = vadd.f32 %v932_v3, %v918_v15  ;;  %v993_v29 = vpop.permute.xlu0 %992 }
 0x2bb   : > { %v938_v41 = vpop.permute.xlu2 %937 }
 0x2bf   : > { %v936_v10 = vpop.permute.xlu1 %935 }
 0x2c3   : > { %v945_v43 = vpop.permute.xlu2 %944 }
 0x2c4   : > { %v948_v16 = vmul.f32 %v945_v43, %v938_v41 }
 0x2c6   : > { %v950_v25 = vadd.f32 %v948_v16, %v934_v20  ;;  %v1101_v16 = vstv %s1100_s15 }
 0x2c7   : > { %v941_v45 = vpop.permute.xlu1 %940  ;;  %vm1107_vm12 = vweird.f32 %v1101_v16 }
 0x2c8   : > { %v947_v11 = vmul.f32 %v941_v45, %v936_v10  ;;  %v1043_v10 = vsel %vm1042_vm5, %v1544_v54, %v1039_v35  ;;  %v1055_v45 = vcvt.s32.f32 %v1000_v30 }
 0x2ca   : > { %v949_v21 = vadd.f32 %v947_v11, %v933_v4 }
 0x2cc   : > { %v957_v50 = vpop.permute.xlu2 %956 }
 0x2cd   : > { %v963_v17 = vmul.f32 %v957_v50, %v952_v48 }
 0x2cf   : > { %v954_v51 = vpop.permute.xlu1 %953  ;;  %v965_v26 = vadd.f32 %v963_v17, %v949_v21  ;;  %v1113_v21 = vand.u32 2147483648, %v1101_v16 }
 0x2d0   : > { %v964_v22 = vmul.f32 %v961_v53, %v954_v51 }
 0x2d1   : > { %v1114_v24 = vor.u32 1.1754944e-38, %v1113_v21 }
 0x2d2   : > { %v966_v32 = vadd.f32 %v964_v22, %v950_v25 }
 0x2d4   : > { %v970_v55 = vpop.permute.xlu2 %969 }
 0x2d7   : > { %v968_v58 = vpop.permute.xlu1 %967 }
 0x2dc   : > { %v977_v6 = vpop.permute.xlu2 %976 }
 0x2dd   : > { %v980_v27 = vmul.f32 %v977_v6, %v970_v55  ;;  %v1076_v55 = vstv %s2158_s9 }
 0x2de   : > { %vm1077_vm9 = vcmp.lt.s32.totalorder %v1074_v52, %v1076_v55  ;;  %vm1078_vm10 = vcmp.lt.s32.totalorder %v1075_v56, %v1076_v55 }
 0x2df   : > { %v973_v13 = vpop.permute.xlu1 %972  ;;  %v982_v36 = vadd.f32 %v980_v27, %v966_v32  ;;  %v2168_v61 = vsel %vm1077_vm9, 1.0, %v1773_v60 }
 0x2e0   : > { %v979_v23 = vmul.f32 %v973_v13, %v968_v58 }
 0x2e2   : > { %v981_v33 = vadd.f32 %v979_v23, %v965_v26  ;;  %v1111_v23 = vand.u32 2147483647, %v1101_v16 }
 0x2e4   : > { %vm1112_vm15 = vcmp.eq.f32.partialorder %v1111_v23, 8.507059e+37 }
 0x2e5   : > { %v989_v28 = vpop.permute.xlu2 %988 }
 0x2e6   : > { %v995_v14 = vmul.f32 %v989_v28, %v984_v0  ;;  %v2170_v0 = vsel %vm1078_vm10, 1.0, %v1773_v60 }
 0x2e7   : > { %v986_v34 = vpop.permute.xlu1 %985 }
 0x2e8   : > { %v997_v37 = vadd.f32 %v995_v14, %v981_v33  ;;  %v996_v38 = vmul.f32 %v993_v29, %v986_v34 }
 0x2ea   : > { %v998_v40 = vadd.f32 %v996_v38, %v982_v36  ;;  %v1044_v41 = vmul.f32 %v1033_v39, %v997_v37 }
 0x2ec   : > { %v1047_v42 = vsel %vm1046_vm6, %v1044_v41, -inf  ;;  %v1045_v43 = vmul.f32 %v1043_v10, %v998_v40 }
 0x2ed   : > { %1049 = vmax.xlane.f32.xlu1 %v1047_v42 }
 0x2ee   : > { %v1048_v44 = vsel %vm1046_vm6, %v1045_v43, -inf }
 0x2ef   : > { %1051 = vmax.xlane.f32.xlu2 %v1048_v44 }
 0x360   : > { %v1050_v46 = vpop.xlane.xlu1 %1049 }
 0x361   : > { %vm1053_vm7 = vcmp.ge.f32.partialorder %v1047_v42, %v1050_v46 }
 0x362   : > { %v1056_v47 = vsel %vm1053_vm7, %v1055_v45, 128.0  ;;  %v1052_v48 = vpop.xlane.xlu2 %1051 }
 0x363   : > { %vm1054_vm8 = vcmp.ge.f32.partialorder %v1048_v44, %v1052_v48  ;;  %1058 = vmin.xlane.f32.xlu0 %v1056_v47 }
 0x364   : > { %v1057_v49 = vsel %vm1054_vm8, %v1055_v45, 128.0 }
 0x365   : > { %1060 = vmin.xlane.f32.xlu2 %v1057_v49 }
 0x3d6   : > { %v1059_v50 = vpop.xlane.xlu0 %1058 }
 0x3d7   : > { %v1062_v51 = vadd.f32 20.0, %v1059_v50 }
 0x3d8   : > { %v1061_v53 = vpop.xlane.xlu2 %1060 }
 0x3d9   : > { %1545 = vlog2.f32 %v1062_v51  ;;  %v1063_v54 = vadd.f32 20.0, %v1061_v53 }
 0x3db   : > { %1547 = vlog2.f32 %v1063_v54 }
 0x3dc   : > { %1549 = vrcp.f32 %v1101_v16 }
 0x3df   : > { %v1546_v57 = vpop.eup %1545 }
 0x3e0   : > { %v1065_v58 = vmul.f32 0.6931472, %v1546_v57 }
 0x3e1   : > { %v1548_v59 = vpop.eup %1547 }
 0x3e2   : > { %v1068_v62 = vsub.f32 9.680344, %v1065_v58  ;;  %v1067_v63 = vmul.f32 0.6931472, %v1548_v59  ;;  %v1550_v17 = vpop.eup %1549 }
 0x3e3   : > { %v1103_v18 = vmul.f32 %v1550_v17, %v1101_v16  ;;  %vm1108_vm13 = vweird.f32 %v1550_v17 }
 0x3e4   : > { %1071 = vst.msk [vmem:[%s2166_s13] sm:$0xff] %vm1070_vm11, %v1068_v62  ;;  %v1083_v1 = vmul.f32 %v2168_v61, %v1068_v62  ;;  %v1069_v2 = vsub.f32 9.680344, %v1067_v63  ;;  %vm1109_vm14 = vmor %vm1107_vm12, %vm1108_vm13 }
 0x3e5   : > { %v1104_v19 = vsub.f32 1.0, %v1103_v18 }
 0x3e6   : > { %1072 = vst.msk [vmem:[%s2166_s13 + $0x8] sm:$0xff] %vm1070_vm11, %v1069_v2  ;;  %v1084_v5 = vmul.f32 %v2170_v0, %v1069_v2  ;;  %v1085_v6 = vsel %vm1070_vm11, %v1083_v1, 0.0 }
 0x3e7   : > { %v1105_v20 = vmul.f32 %v1550_v17, %v1104_v19 }
 0x3e8   : > { %v1086_v7 = vsel %vm1070_vm11, %v1084_v5, 0.0 }
 0x3e9   : > { %v1087_v8 = vadd.f32 %v1086_v7, %v1085_v6  ;;  %v1106_v22 = vadd.f32 %v1550_v17, %v1105_v20 }
 0x3eb   : > { %1088 = vadd.xlane.f32.xlu1 %v1087_v8  ;;  %v1110_v25 = vsel %vm1109_vm14, %v1550_v17, %v1106_v22  ;;  %v1117_v29 = vld [vmem:[%s2166_s13] sm:$0xff] }
 0x3ec   : > { %v1115_v26 = vsel %vm1112_vm15, %v1114_v24, %v1110_v25 }
 0x3ed   : > { %v1118_v30 = vld [vmem:[%s2166_s13 + $0x8] sm:$0xff] }
 0x45e   : > { %v1089_v9 = vpop.xlane.xlu1 %1088 }
 0x45f   : > { %v1090_v3 = vrot.slane %v1089_v9, 4 }
 0x461   : > { %v1091_v11 = vadd.f32 %v1090_v3, %v1089_v9 }
 0x463   : > { %v1092_v12 = vrot.slane %v1091_v11, 2 }
 0x465   : > { %v1093_v13 = vadd.f32 %v1092_v12, %v1091_v11 }
 0x467   : > { %v1094_v15 = vrot.slane %v1093_v13, 1 }
 0x469   : > { %v1095_v4 = vadd.f32 %v1094_v15, %v1093_v13 }
 0x46b   : > { %1287 = vpush %v1095_v4 }
 0x49c   : > { %s1288_s16 = spop %1287 }
 0x49d   : > { %v1097_v27 = vstv %s1288_s16 }
 0x49e   : > { %v1116_v28 = vmul.f32 %v1115_v26, %v1097_v27 }
 0x4a0   : > { %v1119_v31 = vsub.f32 %v1117_v29, %v1116_v28  ;;  %v1120_v32 = vsub.f32 %v1118_v30, %v1116_v28 }
 0x4a2   : > { %v1121_v33 = vmul.f32 %v2168_v61, %v1119_v31  ;;  %v1122_v14 = vmul.f32 %v2170_v0, %v1120_v32 }
 0x4a4   : > { %v1123_v34 = vmul.f32 %v1121_v33, %v1121_v33  ;;  %v1124_v35 = vmul.f32 %v1122_v14, %v1122_v14 }
 0x4a6   : > { %v1125_v36 = vsel %vm1070_vm11, %v1123_v34, 0.0  ;;  %v1126_v37 = vsel %vm1070_vm11, %v1124_v35, 0.0 }
 0x4a7   : > { %v1127_v38 = vadd.f32 %v1126_v37, %v1125_v36 }
 0x4a9   : > { %1128 = vadd.xlane.f32.xlu2 %v1127_v38 }
 0x51c   : > { %v1129_v39 = vpop.xlane.xlu2 %1128 }
 0x51d   : > { %v1130_v40 = vrot.slane %v1129_v39, 4 }
 0x51f   : > { %v1131_v41 = vadd.f32 %v1130_v40, %v1129_v39 }
 0x521   : > { %v1132_v10 = vrot.slane %v1131_v41, 2 }
 0x523   : > { %v1133_v42 = vadd.f32 %v1132_v10, %v1131_v41 }
 0x525   : > { %v1134_v43 = vrot.slane %v1133_v42, 1 }
 0x527   : > { %v1135_v44 = vadd.f32 %v1134_v43, %v1133_v42 }
 0x529   : > { %1289 = vpush %v1135_v44 }
 0x55a   : > { %s1290_s21 = spop %1289 }
 0x55b   : > { %v1137_v45 = vstv %s1290_s21 }
 0x55c   : > { %v1139_v46 = vmul.f32 %v1137_v45, %v1115_v26 }
 0x55e   : > { %1551 = vrsqrt.f32 %v1139_v46  ;;  %vm1147_vm0 = vcmp.eq.f32.partialorder %v1139_v46, inf  ;;  %v1150_v54 = vand.u32 2147483648, %v1139_v46  ;;  %vm1149_vm1 = vcmp.eq.f32.partialorder %v1139_v46, 0.0 }
 0x564   : > { %v1552_v47 = vpop.eup %1551 }
 0x565   : > { %v1141_v48 = vmul.f32 %v1552_v47, %v1139_v46 }
 0x567   : > { %v1142_v49 = vmul.f32 %v1552_v47, %v1141_v48 }
 0x569   : > { %v1143_v50 = vmul.f32 0.5, %v1142_v49 }
 0x56b   : > { %v1144_v51 = vsub.f32 1.5, %v1143_v50 }
 0x56d   : > { %v1145_v52 = vmul.f32 %v1552_v47, %v1144_v51 }
 0x56f   : > { %v1146_v53 = vmul.f32 %v1145_v52, %v1139_v46 }
 0x571   : > { %v1148_v55 = vsel %vm1147_vm0, %v1139_v46, %v1146_v53 }
 0x572   : > { %v1151_v56 = vsel %vm1149_vm1, %v1150_v54, %v1148_v55 }
 0x573   : > { %v1152_v57 = vadd.f32 1e-12, %v1151_v56 }
 0x575   : > { %1553 = vrcp.f32 %v1152_v57  ;;  %v1164_v62 = vand.u32 2147483648, %v1152_v57  ;;  %v1162_v1 = vand.u32 2147483647, %v1152_v57  ;;  %vm1158_vm3 = vweird.f32 %v1152_v57 }
 0x577   : > { %v1165_v5 = vor.u32 1.1754944e-38, %v1164_v62  ;;  %vm1163_vm5 = vcmp.eq.f32.partialorder %v1162_v1, 8.507059e+37 }
 0x57b   : > { %v1554_v58 = vpop.eup %1553 }
 0x57c   : > { %v1154_v59 = vmul.f32 %v1554_v58, %v1152_v57  ;;  %vm1159_vm2 = vweird.f32 %v1554_v58 }
 0x57d   : > { %vm1160_vm4 = vmor %vm1158_vm3, %vm1159_vm2 }
 0x57e   : > { %v1155_v60 = vsub.f32 1.0, %v1154_v59 }
 0x580   : > { %v1156_v63 = vmul.f32 %v1554_v58, %v1155_v60 }
 0x582   : > { %v1157_v2 = vadd.f32 %v1554_v58, %v1156_v63 }
 0x584   : > { %v1161_v6 = vsel %vm1160_vm4, %v1554_v58, %v1157_v2 }
 0x585   : > { %v1166_v7 = vsel %vm1163_vm5, %v1165_v5, %v1161_v6 }
 0x586   : > { %v1168_v8 = vmul.f32 %v1166_v7, %v1119_v31  ;;  %v1169_v9 = vmul.f32 %v1166_v7, %v1120_v32 }
 0x588   : > { %v1170_v3 = vmul.f32 %v2168_v61, %v1168_v8  ;;  %v1171_v11 = vmul.f32 %v2170_v0, %v1169_v9 }
 0x58a   : > { %1172 = vst.msk [vmem:[%s2166_s13] sm:$0xff] %vm1070_vm11, %v1170_v3 }
 0x58b   : > { %1173 = vst.msk [vmem:[%s2166_s13 + $0x8] sm:$0xff] %vm1070_vm11, %v1171_v11 }
 0x58c PF: > { %p22_p4 = scmp.ge.s32.totalorder %s1841_s27, 4   ;;  %s2213_s16 = smov %s1661_s17 }
 0x58d   : > { %s2214_s17 = smov %s1665_s18  ;;  %s2215_s18 = smov %s1854_s5 }
 0x58e   : > { %s2216_s19 = smov %s1841_s27  ;;  %24 = sbr.rel (!%p22_p4) target bundleno = 10 (0xa), region = 73 }
 0x593   :  { %1195 = vsyncpa [#allocation5], 1 }
 0x594   :  { %1197 = vsyncpa [#allocation5 + $0x1], 1 }
 0x595   :  { %1198 = vsyncpa [#allocation7], 1 }
 0x596   :  { %1200 = vsyncpa [#allocation7 + $0x1], 1 }

</bundles_post_ra>
